<compile_context>
chip_gen: v5e
topology: v5e:2x2
jax: 0.10.0
libtpu: 0.0.40
codegen_flags: <defaults>
</compile_context>

<pallas_src>
import jax
import jax.numpy as jnp
from jax import lax
from jax.experimental import pallas as pl
from jax.experimental.pallas import tpu as pltpu

BN_EPS = 1e-5
KSIZE = 7  # Conv1d kernel size in CBW_BasicBlock


# ----------------------------------------------------------------------------- kernel
def _bn_train(h, count):
    """Training-mode BatchNorm1d(1): stats over all elements, gamma=1, beta=0."""
    mean = jnp.sum(h, keepdims=True) / count                      # (1, 1)
    var = jnp.sum(h * h, keepdims=True) / count - mean * mean     # biased variance
    return (h - mean) * lax.rsqrt(var + BN_EPS)


def _cbw_kernel(x_ref, m1_ref, m2_ref, o_ref):
    nc = x_ref.shape[0]
    inv_hw = 1.0 / x_ref.shape[1]

    # Global average pool: AvgPool2d(patch_size) with H = W = patch_size == row mean.
    s = jnp.sum(x_ref[...], axis=1, keepdims=True) * inv_hw       # (N*C, 1)

    # Conv1d(1,1,7,pad=3,bias=False) along C as block-diagonal Toeplitz matmul + BN + ReLU.
    h1 = jnp.dot(m1_ref[...], s, preferred_element_type=jnp.float32)
    h1 = jnp.maximum(_bn_train(h1, nc), 0.0)
    h2 = jnp.dot(m2_ref[...], h1, preferred_element_type=jnp.float32)
    h2 = jnp.maximum(_bn_train(h2, nc), 0.0)

    # Residual sum, final BN, sigmoid gate.
    t = _bn_train(h1 + h2 + s, nc)
    gate = 1.0 / (1.0 + jnp.exp(-t))                              # (N*C, 1)

    # Channel-wise re-weighting of the original input (lane broadcast of the column).
    o_ref[...] = x_ref[...] * gate


# ----------------------------------------------------------------------------- wrapper
def _conv7_toeplitz(w, length):
    """T[i, j] = w[j - i + 3] inside the 7-tap band, 0 elsewhere (PyTorch cross-correlation)."""
    half = (KSIZE - 1) // 2
    i = jnp.arange(length)[:, None]
    j = jnp.arange(length)[None, :]
    idx = j - i + half
    band = (idx >= 0) & (idx < KSIZE)
    return jnp.where(band, w[jnp.clip(idx, 0, KSIZE - 1)], 0.0).astype(jnp.float32)


@jax.jit
def cbw_forward(x, w1, w2):
    """x: (N, C, H, W) with H == W == patch_size; w1, w2: (7,) Conv1d filters (no bias)."""
    n, c, h, wd = x.shape
    x2d = x.reshape(n * c, h * wd).astype(jnp.float32)

    # Fold each Conv1d into a block-diagonal (per-batch-element) Toeplitz operator so the
    # kernel applies it with a single tiny matmul in the (N*C, 1) column layout.
    eye_n = jnp.eye(n, dtype=jnp.float32)
    m1 = jnp.kron(eye_n, _conv7_toeplitz(w1.astype(jnp.float32), c))
    m2 = jnp.kron(eye_n, _conv7_toeplitz(w2.astype(jnp.float32), c))

    nc, hw = x2d.shape
    out2d = pl.pallas_call(
        _cbw_kernel,
        out_shape=jax.ShapeDtypeStruct((nc, hw), jnp.float32),
        grid=(1,),
        in_specs=[
            pl.BlockSpec((nc, hw), lambda i: (0, 0)),   # x, full block (read once)
            pl.BlockSpec((nc, nc), lambda i: (0, 0)),   # Toeplitz op for conv1d_1
            pl.BlockSpec((nc, nc), lambda i: (0, 0)),   # Toeplitz op for conv1d_12
        ],
        out_specs=pl.BlockSpec((nc, hw), lambda i: (0, 0)),
        compiler_params=pltpu.CompilerParams(dimension_semantics=("arbitrary",)),
    )(x2d, m1, m2)
    return out2d.reshape(n, c, h, wd)


# ----------------------------------------------------------------------------- reference
def cbw_reference(x, w1, w2):
    n, c, h, wd = x.shape
    s = jnp.mean(x, axis=(2, 3))                                   # (N, C) global avg pool

    def conv7(v, w):
        vp = jnp.pad(v, ((0, 0), (3, 3)))
        return sum(w[k] * vp[:, k:k + c] for k in range(KSIZE))

    def bn(v):
        m = jnp.mean(v)
        var = jnp.mean((v - m) ** 2)
        return (v - m) / jnp.sqrt(var + BN_EPS)

    out0 = s
    out1 = jax.nn.relu(bn(conv7(out0, w1)))
    out2 = jax.nn.relu(bn(conv7(out1, w2)))
    gate = jax.nn.sigmoid(bn(out1 + out2 + out0))
    return x * gate[:, :, None, None]


# ----------------------------------------------------------------------------- main
if __name__ == "__main__":
    key = jax.random.PRNGKey(0)
    k_x, k_w1, k_w2 = jax.random.split(key, 3)

    # AvgPool2d(patch_size, stride=1, padding=0) followed by squeeze(3)/Conv1d requires
    # the spatial size to equal patch_size (module default 11).
    batch, channels, patch_size = 2, 64, 11
    x = jax.random.normal(k_x, (batch, channels, patch_size, patch_size), jnp.float32)
    w1 = jax.random.normal(k_w1, (KSIZE,), jnp.float32) * 0.3
    w2 = jax.random.normal(k_w2, (KSIZE,), jnp.float32) * 0.3

    out = jax.block_until_ready(cbw_forward(x, w1, w2))

    assert out.shape == x.shape, out.shape
    assert bool(jnp.all(jnp.isfinite(out)))
    ref = cbw_reference(x, w1, w2)
    assert bool(jnp.allclose(out, ref, atol=1e-4, rtol=1e-4)), float(
        jnp.max(jnp.abs(out - ref)))
    print("KERNEL_OK")
</pallas_src>

<mosaic_0001>
module attributes {stable_mosaic.version = 11 : i64} {
  func.func @_cbw_kernel(%arg0: i32, %arg1: memref<128x121xf32, #tpu.memory_space<vmem>>, %arg2: memref<128x128xf32, #tpu.memory_space<vmem>>, %arg3: memref<128x128xf32, #tpu.memory_space<vmem>>, %arg4: memref<128x121xf32, #tpu.memory_space<vmem>>) attributes {dimension_semantics = [#tpu.dimension_semantics<arbitrary>], iteration_bounds = array<i64: 1>, scalar_prefetch = 0 : i64, scratch_operands = 0 : i64, tpu.core_type = #tpu.core_type<tc>, window_params = [{pipeline_mode = #tpu.pipeline_mode<synchronous>, transform_indices = @transform_0, window_bounds = array<i64: 128, 121>}, {pipeline_mode = #tpu.pipeline_mode<synchronous>, transform_indices = @transform_1, window_bounds = array<i64: 128, 128>}, {pipeline_mode = #tpu.pipeline_mode<synchronous>, transform_indices = @transform_2, window_bounds = array<i64: 128, 128>}, {pipeline_mode = #tpu.pipeline_mode<synchronous>, transform_indices = @transform_3, window_bounds = array<i64: 128, 121>}]} {
    %c0 = arith.constant 0 : index
    %c0_0 = arith.constant 0 : index
    %0 = vector.load %arg1[%c0, %c0_0] : memref<128x121xf32, #tpu.memory_space<vmem>>, vector<128x121xf32>
    %cst = arith.constant dense<0.000000e+00> : vector<128xf32>
    %1 = vector.multi_reduction <add>, %0, %cst [1] : vector<128x121xf32> to vector<128xf32>
    %2 = vector.shape_cast %1 : vector<128xf32> to vector<128x1xf32>
    %cst_1 = arith.constant 0.00826446246 : f32
    %3 = vector.broadcast %cst_1 : f32 to vector<128x1xf32>
    %4 = arith.mulf %2, %3 : vector<128x1xf32>
    %c0_2 = arith.constant 0 : index
    %c0_3 = arith.constant 0 : index
    %5 = vector.load %arg2[%c0_2, %c0_3] : memref<128x128xf32, #tpu.memory_space<vmem>>, vector<128x128xf32>
    %cst_4 = arith.constant dense<0.000000e+00> : vector<128x1xf32>
    %6 = tpu.matmul %5, %4, %cst_4 {dimension_numbers = #tpu.dot_dimension_numbers<[1], [0], [0], [1], [0, 0, 1, 1], [], []>} : vector<128x128xf32>, vector<128x1xf32>, vector<128x1xf32> -> vector<128x1xf32>
    %7 = vector.shape_cast %6 : vector<128x1xf32> to vector<1x128x1xf32>
    %cst_5 = arith.constant dense<0.000000e+00> : vector<1xf32>
    %8 = vector.multi_reduction <add>, %7, %cst_5 [1, 2] : vector<1x128x1xf32> to vector<1xf32>
    %9 = vector.shape_cast %8 : vector<1xf32> to vector<1x1x1xf32>
    %10 = vector.extract %9[0, 0, 0] : f32 from vector<1x1x1xf32>
    %11 = vector.broadcast %10 : f32 to vector<1x1xf32>
    %cst_6 = arith.constant 1.280000e+02 : f32
    %12 = vector.broadcast %cst_6 : f32 to vector<1x1xf32>
    %13 = arith.divf %11, %12 : vector<1x1xf32>
    %14 = arith.mulf %6, %6 : vector<128x1xf32>
    %15 = vector.shape_cast %14 : vector<128x1xf32> to vector<1x128x1xf32>
    %cst_7 = arith.constant dense<0.000000e+00> : vector<1xf32>
    %16 = vector.multi_reduction <add>, %15, %cst_7 [1, 2] : vector<1x128x1xf32> to vector<1xf32>
    %17 = vector.shape_cast %16 : vector<1xf32> to vector<1x1x1xf32>
    %18 = vector.extract %17[0, 0, 0] : f32 from vector<1x1x1xf32>
    %19 = vector.broadcast %18 : f32 to vector<1x1xf32>
    %cst_8 = arith.constant 1.280000e+02 : f32
    %20 = vector.broadcast %cst_8 : f32 to vector<1x1xf32>
    %21 = arith.divf %19, %20 : vector<1x1xf32>
    %22 = arith.mulf %13, %13 : vector<1x1xf32>
    %23 = arith.subf %21, %22 : vector<1x1xf32>
    %24 = vector.broadcast %13 : vector<1x1xf32> to vector<128x1xf32>
    %25 = arith.subf %6, %24 : vector<128x1xf32>
    %cst_9 = arith.constant 9.99999974E-6 : f32
    %26 = vector.broadcast %cst_9 : f32 to vector<1x1xf32>
    %27 = arith.addf %23, %26 : vector<1x1xf32>
    %28 = math.rsqrt %27 : vector<1x1xf32>
    %29 = vector.broadcast %28 : vector<1x1xf32> to vector<128x1xf32>
    %30 = arith.mulf %25, %29 : vector<128x1xf32>
    %cst_10 = arith.constant 0.000000e+00 : f32
    %31 = vector.broadcast %cst_10 : f32 to vector<128x1xf32>
    %32 = arith.maximumf %30, %31 : vector<128x1xf32>
    %c0_11 = arith.constant 0 : index
    %c0_12 = arith.constant 0 : index
    %33 = vector.load %arg3[%c0_11, %c0_12] : memref<128x128xf32, #tpu.memory_space<vmem>>, vector<128x128xf32>
    %cst_13 = arith.constant dense<0.000000e+00> : vector<128x1xf32>
    %34 = tpu.matmul %33, %32, %cst_13 {dimension_numbers = #tpu.dot_dimension_numbers<[1], [0], [0], [1], [0, 0, 1, 1], [], []>} : vector<128x128xf32>, vector<128x1xf32>, vector<128x1xf32> -> vector<128x1xf32>
    %35 = vector.shape_cast %34 : vector<128x1xf32> to vector<1x128x1xf32>
    %cst_14 = arith.constant dense<0.000000e+00> : vector<1xf32>
    %36 = vector.multi_reduction <add>, %35, %cst_14 [1, 2] : vector<1x128x1xf32> to vector<1xf32>
    %37 = vector.shape_cast %36 : vector<1xf32> to vector<1x1x1xf32>
    %38 = vector.extract %37[0, 0, 0] : f32 from vector<1x1x1xf32>
    %39 = vector.broadcast %38 : f32 to vector<1x1xf32>
    %cst_15 = arith.constant 1.280000e+02 : f32
    %40 = vector.broadcast %cst_15 : f32 to vector<1x1xf32>
    %41 = arith.divf %39, %40 : vector<1x1xf32>
    %42 = arith.mulf %34, %34 : vector<128x1xf32>
    %43 = vector.shape_cast %42 : vector<128x1xf32> to vector<1x128x1xf32>
    %cst_16 = arith.constant dense<0.000000e+00> : vector<1xf32>
    %44 = vector.multi_reduction <add>, %43, %cst_16 [1, 2] : vector<1x128x1xf32> to vector<1xf32>
    %45 = vector.shape_cast %44 : vector<1xf32> to vector<1x1x1xf32>
    %46 = vector.extract %45[0, 0, 0] : f32 from vector<1x1x1xf32>
    %47 = vector.broadcast %46 : f32 to vector<1x1xf32>
    %cst_17 = arith.constant 1.280000e+02 : f32
    %48 = vector.broadcast %cst_17 : f32 to vector<1x1xf32>
    %49 = arith.divf %47, %48 : vector<1x1xf32>
    %50 = arith.mulf %41, %41 : vector<1x1xf32>
    %51 = arith.subf %49, %50 : vector<1x1xf32>
    %52 = vector.broadcast %41 : vector<1x1xf32> to vector<128x1xf32>
    %53 = arith.subf %34, %52 : vector<128x1xf32>
    %cst_18 = arith.constant 9.99999974E-6 : f32
    %54 = vector.broadcast %cst_18 : f32 to vector<1x1xf32>
    %55 = arith.addf %51, %54 : vector<1x1xf32>
    %56 = math.rsqrt %55 : vector<1x1xf32>
    %57 = vector.broadcast %56 : vector<1x1xf32> to vector<128x1xf32>
    %58 = arith.mulf %53, %57 : vector<128x1xf32>
    %cst_19 = arith.constant 0.000000e+00 : f32
    %59 = vector.broadcast %cst_19 : f32 to vector<128x1xf32>
    %60 = arith.maximumf %58, %59 : vector<128x1xf32>
    %61 = arith.addf %32, %60 : vector<128x1xf32>
    %62 = arith.addf %61, %4 : vector<128x1xf32>
    %63 = vector.shape_cast %62 : vector<128x1xf32> to vector<1x128x1xf32>
    %cst_20 = arith.constant dense<0.000000e+00> : vector<1xf32>
    %64 = vector.multi_reduction <add>, %63, %cst_20 [1, 2] : vector<1x128x1xf32> to vector<1xf32>
    %65 = vector.shape_cast %64 : vector<1xf32> to vector<1x1x1xf32>
    %66 = vector.extract %65[0, 0, 0] : f32 from vector<1x1x1xf32>
    %67 = vector.broadcast %66 : f32 to vector<1x1xf32>
    %cst_21 = arith.constant 1.280000e+02 : f32
    %68 = vector.broadcast %cst_21 : f32 to vector<1x1xf32>
    %69 = arith.divf %67, %68 : vector<1x1xf32>
    %70 = arith.mulf %62, %62 : vector<128x1xf32>
    %71 = vector.shape_cast %70 : vector<128x1xf32> to vector<1x128x1xf32>
    %cst_22 = arith.constant dense<0.000000e+00> : vector<1xf32>
    %72 = vector.multi_reduction <add>, %71, %cst_22 [1, 2] : vector<1x128x1xf32> to vector<1xf32>
    %73 = vector.shape_cast %72 : vector<1xf32> to vector<1x1x1xf32>
    %74 = vector.extract %73[0, 0, 0] : f32 from vector<1x1x1xf32>
    %75 = vector.broadcast %74 : f32 to vector<1x1xf32>
    %cst_23 = arith.constant 1.280000e+02 : f32
    %76 = vector.broadcast %cst_23 : f32 to vector<1x1xf32>
    %77 = arith.divf %75, %76 : vector<1x1xf32>
    %78 = arith.mulf %69, %69 : vector<1x1xf32>
    %79 = arith.subf %77, %78 : vector<1x1xf32>
    %80 = vector.broadcast %69 : vector<1x1xf32> to vector<128x1xf32>
    %81 = arith.subf %62, %80 : vector<128x1xf32>
    %cst_24 = arith.constant 9.99999974E-6 : f32
    %82 = vector.broadcast %cst_24 : f32 to vector<1x1xf32>
    %83 = arith.addf %79, %82 : vector<1x1xf32>
    %84 = math.rsqrt %83 : vector<1x1xf32>
    %85 = vector.broadcast %84 : vector<1x1xf32> to vector<128x1xf32>
    %86 = arith.mulf %81, %85 : vector<128x1xf32>
    %cst_25 = arith.constant 0.000000e+00 : f32
    %87 = vector.broadcast %cst_25 : f32 to vector<128x1xf32>
    %88 = arith.subf %87, %86 : vector<128x1xf32>
    %89 = math.exp %88 : vector<128x1xf32>
    %cst_26 = arith.constant 1.000000e+00 : f32
    %90 = vector.broadcast %cst_26 : f32 to vector<128x1xf32>
    %91 = arith.addf %90, %89 : vector<128x1xf32>
    %cst_27 = arith.constant 1.000000e+00 : f32
    %92 = vector.broadcast %cst_27 : f32 to vector<128x1xf32>
    %93 = arith.divf %92, %91 : vector<128x1xf32>
    %c0_28 = arith.constant 0 : index
    %c0_29 = arith.constant 0 : index
    %94 = vector.load %arg1[%c0_28, %c0_29] : memref<128x121xf32, #tpu.memory_space<vmem>>, vector<128x121xf32>
    %95 = vector.broadcast %93 : vector<128x1xf32> to vector<128x121xf32>
    %96 = arith.mulf %94, %95 : vector<128x121xf32>
    %c0_30 = arith.constant 0 : index
    %c0_31 = arith.constant 0 : index
    %97 = vector.load %arg4[%c0_30, %c0_31] : memref<128x121xf32, #tpu.memory_space<vmem>>, vector<128x121xf32>
    tpu.vector_store %arg4[%c0_30, %c0_31], %96 {strides = array<i32>} : memref<128x121xf32, #tpu.memory_space<vmem>>, vector<128x121xf32>,
    return
  }
  func.func @transform_0(%arg0: i32) -> (i32, i32) {
    %c0_i32 = arith.constant 0 : i32
    %c0_i32_0 = arith.constant 0 : i32
    %c0_i32_1 = arith.constant 0 : i32
    return %c0_i32, %c0_i32_0 : i32, i32
  }
  func.func @transform_1(%arg0: i32) -> (i32, i32) {
    %c0_i32 = arith.constant 0 : i32
    %c0_i32_0 = arith.constant 0 : i32
    %c0_i32_1 = arith.constant 0 : i32
    return %c0_i32, %c0_i32_0 : i32, i32
  }
  func.func @transform_2(%arg0: i32) -> (i32, i32) {
    %c0_i32 = arith.constant 0 : i32
    %c0_i32_0 = arith.constant 0 : i32
    %c0_i32_1 = arith.constant 0 : i32
    return %c0_i32, %c0_i32_0 : i32, i32
  }
  func.func @transform_3(%arg0: i32) -> (i32, i32) {
    %c0_i32 = arith.constant 0 : i32
    %c0_i32_0 = arith.constant 0 : i32
    %c0_i32_1 = arith.constant 0 : i32
    return %c0_i32, %c0_i32_0 : i32, i32
  }
}

</mosaic_0001>

<bundles_post_ra>
// kernel: cbw_forward.1
= control target key start
LH: loop header
LB: loop body
LE: loop exit
PB: predicated region body
PF: predicated region fallthrough
CT: control target
= control target key end

     0   :  { %vm30_vm0 = vcmask 990208   ;;  %vm176_vm1 = vcmask 7168   ;;  %s2515_s0 = inlined_call_operand.vmem [shape: f32[128,121], index: 0, kind: input, shape index: {}]   ;;  %s2516_s1 = inlined_call_operand.vmem [shape: f32[128,128], index: 1, kind: input, shape index: {}]   ;;  %s2517_s2 = inlined_call_operand.vmem [shape: f32[128,128], index: 2, kind: input, shape index: {}]   ;;  %s2518_s3 = inlined_call_operand.vmem [shape: f32[128,121], index: 3, kind: output, shape index: {}]  }
   0x1   :  { %v29_v0 = vld [vmem:[%s2515_s0 + $0x78] sm:$0xff]  ;;  %v27_v1 = vld [vmem:[%s2515_s0 + $0x68] sm:$0xff]  ;;  %v28_v6 = vld [vmem:[%s2515_s0 + $0x70] sm:$0xff] }
   0x2   :  { %v25_v2 = vld [vmem:[%s2515_s0 + $0x58] sm:$0xff]  ;;  %v76_v3 = vsel %vm30_vm0, %v29_v0, 0.0  ;;  %v70_v4 = vsel %vm30_vm0, %v27_v1, 0.0  ;;  %v26_v7 = vld [vmem:[%s2515_s0 + $0x60] sm:$0xff]  ;;  %v24_v8 = vld [vmem:[%s2515_s0 + $0x50] sm:$0xff]  ;;  %v73_v9 = vsel %vm30_vm0, %v28_v6, 0.0 }
   0x3   :  { %v64_v5 = vsel %vm30_vm0, %v25_v2, 0.0  ;;  %77 = vadd.xlane.f32.xlu0 %v76_v3  ;;  %71 = vadd.xlane.f32.xlu1 %v70_v4  ;;  %v67_v10 = vsel %vm30_vm0, %v26_v7, 0.0  ;;  %v61_v11 = vsel %vm30_vm0, %v24_v8, 0.0  ;;  %v23_v12 = vld [vmem:[%s2515_s0 + $0x48] sm:$0xff]  ;;  %v22_v13 = vld [vmem:[%s2515_s0 + $0x40] sm:$0xff]  ;;  %v21_v14 = vld [vmem:[%s2515_s0 + $0x38] sm:$0xff] }
   0x4   :  { %65 = vadd.xlane.f32.xlu2 %v64_v5  ;;  %v58_v15 = vsel %vm30_vm0, %v23_v12, 0.0  ;;  %v55_v16 = vsel %vm30_vm0, %v22_v13, 0.0  ;;  %v52_v17 = vsel %vm30_vm0, %v21_v14, 0.0  ;;  %v20_v18 = vld [vmem:[%s2515_s0 + $0x30] sm:$0xff]  ;;  %v19_v19 = vld [vmem:[%s2515_s0 + $0x28] sm:$0xff]  ;;  %v18_v20 = vld [vmem:[%s2515_s0 + $0x20] sm:$0xff] }
   0x5   :  { %v49_v21 = vsel %vm30_vm0, %v20_v18, 0.0  ;;  %v46_v22 = vsel %vm30_vm0, %v19_v19, 0.0  ;;  %v43_v23 = vsel %vm30_vm0, %v18_v20, 0.0  ;;  %v17_v24 = vld [vmem:[%s2515_s0 + $0x18] sm:$0xff]  ;;  %v16_v25 = vld [vmem:[%s2515_s0 + $0x10] sm:$0xff]  ;;  %v15_v26 = vld [vmem:[%s2515_s0 + $0x8] sm:$0xff] }
   0x6   :  { %v40_v27 = vsel %vm30_vm0, %v17_v24, 0.0  ;;  %v37_v28 = vsel %vm30_vm0, %v16_v25, 0.0  ;;  %v34_v29 = vsel %vm30_vm0, %v15_v26, 0.0  ;;  %v14_v30 = vld [vmem:[%s2515_s0] sm:$0xff]  ;;  %v96_v2 = vld [vmem:[%s2516_s1 + $0x8] sm:$0xff]  ;;  %v97_v4 = vld [vmem:[%s2516_s1 + $0x10] sm:$0xff] }
   0x7   :  { %v31_v31 = vsel %vm30_vm0, %v14_v30, 0.0  ;;  %v95_v0 = vld [vmem:[%s2516_s1] sm:$0xff]  ;;  %v104_v3 = vld [vmem:[%s2516_s1 + $0x48] sm:$0xff]  ;;  %v105_v5 = vld [vmem:[%s2516_s1 + $0x50] sm:$0xff] }
   0x8   :  { %v103_v1 = vld [vmem:[%s2516_s1 + $0x40] sm:$0xff]  ;;  %v98_v6 = vld [vmem:[%s2516_s1 + $0x18] sm:$0xff]  ;;  %v101_v12 = vld [vmem:[%s2516_s1 + $0x30] sm:$0xff] }
   0x9   :  { %v106_v7 = vld [vmem:[%s2516_s1 + $0x58] sm:$0xff]  ;;  %v99_v8 = vld [vmem:[%s2516_s1 + $0x20] sm:$0xff]  ;;  %v109_v13 = vld [vmem:[%s2516_s1 + $0x70] sm:$0xff] }
   0xa   :  { %v102_v14 = vld [vmem:[%s2516_s1 + $0x38] sm:$0xff] }
   0xb   :  { %74 = vadd.xlane.f32.xlu0 %v73_v9  ;;  %68 = vadd.xlane.f32.xlu1 %v67_v10  ;;  %v107_v9 = vld [vmem:[%s2516_s1 + $0x60] sm:$0xff]  ;;  %v100_v10 = vld [vmem:[%s2516_s1 + $0x28] sm:$0xff] }
   0xc   :  { %62 = vadd.xlane.f32.xlu2 %v61_v11  ;;  %v108_v11 = vld [vmem:[%s2516_s1 + $0x68] sm:$0xff] }
  0x13   :  { %59 = vadd.xlane.f32.xlu0 %v58_v15  ;;  %56 = vadd.xlane.f32.xlu1 %v55_v16  ;;  %v110_v15 = vld [vmem:[%s2516_s1 + $0x78] sm:$0xff] }
  0x14   :  { %53 = vadd.xlane.f32.xlu2 %v52_v17 }
  0x1b   :  { %50 = vadd.xlane.f32.xlu0 %v49_v21  ;;  %47 = vadd.xlane.f32.xlu1 %v46_v22 }
  0x1c   :  { %44 = vadd.xlane.f32.xlu2 %v43_v23 }
  0x23   :  { %41 = vadd.xlane.f32.xlu0 %v40_v27  ;;  %38 = vadd.xlane.f32.xlu1 %v37_v28 }
  0x24   :  { %35 = vadd.xlane.f32.xlu2 %v34_v29 }
  0x2b   :  { %32 = vadd.xlane.f32.xlu0 %v31_v31 }
  0x76   :  { %v78_v32 = vpop.xlane.xlu0 %77  ;;  %v72_v33 = vpop.xlane.xlu1 %71 }
  0x77   :  { %v1407_v34 = vmul.f32 0.008264462, %v78_v32  ;;  %v66_v35 = vpop.xlane.xlu2 %65  ;;  %v1413_v40 = vmul.f32 0.008264462, %v72_v33 }
  0x78   :  { %v1421_v42 = vmul.f32 0.008264462, %v66_v35 }
  0x79   :  { %2527 = vst [vmem:[#allocation2_spill] sm:$0xff] %v1407_v34  ;;  %111 = vmatpush.msra.mxu0 %v1407_v34  ;;  %1184 = vmatpush.msra.mxu2 %v1407_v34 }
  0x7a   :  { %2529 = vst [vmem:[#allocation4_spill] sm:$0xff] %v1413_v40 }
  0x7b   :  { %2531 = vst [vmem:[#allocation6_spill] sm:$0xff] %v1421_v42 }
  0x7e   :  { %v75_v36 = vpop.xlane.xlu0 %74  ;;  %v69_v37 = vpop.xlane.xlu1 %68 }
  0x7f   :  { %v1411_v38 = vmul.f32 0.008264462, %v75_v36  ;;  %v63_v39 = vpop.xlane.xlu2 %62  ;;  %v1417_v41 = vmul.f32 0.008264462, %v69_v37 }
  0x80   :  { %v1425_v45 = vmul.f32 0.008264462, %v63_v39 }
  0x81   :  { %2528 = vst [vmem:[#allocation3_spill] sm:$0xff] %v1411_v38  ;;  %112 = vmatpush.msra.mxu0 %v1411_v38  ;;  %1185 = vmatpush.msra.mxu2 %v1411_v38 }
  0x82   :  { %2530 = vst [vmem:[#allocation5_spill] sm:$0xff] %v1417_v41 }
  0x83   :  { %113 = vmatpush.msra.mxu0 %v1413_v40  ;;  %1186 = vmatpush.msra.mxu2 %v1413_v40 }
  0x85   :  { %114 = vmatpush.msra.mxu0 %v1417_v41  ;;  %1187 = vmatpush.msra.mxu2 %v1417_v41 }
  0x86   :  { %v60_v43 = vpop.xlane.xlu0 %59  ;;  %v57_v44 = vpop.xlane.xlu1 %56 }
  0x87   :  { %115 = vmatpush.msra.mxu0 %v1421_v42  ;;  %1188 = vmatpush.msra.mxu2 %v1421_v42  ;;  %v54_v46 = vpop.xlane.xlu2 %53  ;;  %v1429_v47 = vmul.f32 0.008264462, %v60_v43  ;;  %v1433_v48 = vmul.f32 0.008264462, %v57_v44 }
  0x88   :  { %v1437_v49 = vmul.f32 0.008264462, %v54_v46 }
  0x89   :  { %116 = vmatpush.msra.mxu0 %v1425_v45  ;;  %1189 = vmatpush.msra.mxu2 %v1425_v45 }
  0x8b   :  { %117 = vmatpush.msra.mxu0 %v1429_v47  ;;  %1190 = vmatpush.msra.mxu2 %v1429_v47 }
  0x8d   :  { %118 = vmatpush.msra.mxu0 %v1433_v48  ;;  %1191 = vmatpush.msra.mxu2 %v1433_v48 }
  0x8e   :  { %v51_v50 = vpop.xlane.xlu0 %50  ;;  %v48_v51 = vpop.xlane.xlu1 %47 }
  0x8f   :  { %v1441_v52 = vmul.f32 0.008264462, %v51_v50  ;;  %119 = vmatpush.msra.mxu0 %v1437_v49  ;;  %1192 = vmatpush.msra.mxu2 %v1437_v49  ;;  %v1445_v53 = vmul.f32 0.008264462, %v48_v51  ;;  %v45_v54 = vpop.xlane.xlu2 %44 }
  0x90   :  { %v1449_v55 = vmul.f32 0.008264462, %v45_v54 }
  0x91   :  { %120 = vmatpush.msra.mxu0 %v1441_v52  ;;  %1193 = vmatpush.msra.mxu2 %v1441_v52 }
  0x93   :  { %121 = vmatpush.msra.mxu0 %v1445_v53  ;;  %1194 = vmatpush.msra.mxu2 %v1445_v53 }
  0x95   :  { %122 = vmatpush.msra.mxu0 %v1449_v55  ;;  %1195 = vmatpush.msra.mxu2 %v1449_v55 }
  0x96   :  { %v42_v56 = vpop.xlane.xlu0 %41  ;;  %v39_v57 = vpop.xlane.xlu1 %38 }
  0x97   :  { %v1455_v58 = vmul.f32 0.008264462, %v42_v56  ;;  %v1457_v59 = vmul.f32 0.008264462, %v39_v57  ;;  %v36_v60 = vpop.xlane.xlu2 %35 }
  0x98   :  { %v1461_v61 = vmul.f32 0.008264462, %v36_v60 }
  0x99   :  { %123 = vmatpush.msra.mxu0 %v1455_v58  ;;  %1196 = vmatpush.msra.mxu2 %v1455_v58 }
  0x9b   :  { %124 = vmatpush.msra.mxu0 %v1457_v59  ;;  %1197 = vmatpush.msra.mxu2 %v1457_v59 }
  0x9d   :  { %125 = vmatpush.msra.mxu0 %v1461_v61  ;;  %1198 = vmatpush.msra.mxu2 %v1461_v61 }
  0x9e   :  { %v33_v62 = vpop.xlane.xlu0 %32 }
  0x9f   :  { %v1467_v63 = vmul.f32 0.008264462, %v33_v62 }
  0xa1   :  { %126 = vmatpush.msra.mxu0 %v1467_v63  ;;  %1199 = vmatpush.msra.mxu2 %v1467_v63 }
  0xa2   :  { %127 = vmatmul.f32.vlgmr.msra.gmra.mxu0 %v95_v0  ;;  %151 = vmatmul.f32.vlgmr.msra.gmra.mxu2 %v103_v1 }
  0xaa   :  { %130 = vmatmul.f32.gmra.mxu0 %v96_v2  ;;  %154 = vmatmul.f32.gmra.mxu2 %v104_v3 }
  0xb2   :  { %133 = vmatmul.f32.gmra.mxu0 %v97_v4  ;;  %157 = vmatmul.f32.gmra.mxu2 %v105_v5 }
  0xba   :  { %136 = vmatmul.f32.gmra.mxu0 %v98_v6  ;;  %160 = vmatmul.f32.gmra.mxu2 %v106_v7 }
  0xc2   :  { %139 = vmatmul.f32.gmra.mxu0 %v99_v8  ;;  %163 = vmatmul.f32.gmra.mxu2 %v107_v9 }
  0xca   :  { %142 = vmatmul.f32.gmra.mxu0 %v100_v10  ;;  %166 = vmatmul.f32.gmra.mxu2 %v108_v11 }
  0xd2   :  { %145 = vmatmul.f32.gmra.mxu0 %v101_v12  ;;  %169 = vmatmul.f32.gmra.mxu2 %v109_v13 }
  0xda   :  { %148 = vmatmul.f32.gmra.mxu0 %v102_v14  ;;  %172 = vmatmul.f32.gmra.mxu2 %v110_v15 }
 0x11f   :  { %v1519_v16 = vpop.f32.mrf.mxu0 }
 0x120   :  { %v226_v28 = vmul.f32 %v1519_v16, %v1519_v16  ;;  %v177_v31 = vsel %vm176_vm1, %v1519_v16, 0.0 }
 0x122   :  { %v242_v39 = vsel %vm176_vm1, %v226_v28, 0.0 }
 0x125   :  { %v1521_v17 = vpop.f32.mrf.mxu2 }
 0x126   :  { %v234_v15 = vmul.f32 %v1521_v17, %v1521_v17 }
 0x127   :  { %v1523_v18 = vpop.f32.mrf.mxu0 }
 0x128   :  { %v227_v27 = vmul.f32 %v1523_v18, %v1523_v18  ;;  %v178_v29 = vsel %vm176_vm1, %v1523_v18, 0.0 }
 0x129   :  { %v179_v36 = vadd.f32 %v178_v29, %v177_v31  ;;  %v192_v31 = vsel %vm176_vm1, %v1521_v17, 0.0 }
 0x12a   :  { %v243_v32 = vsel %vm176_vm1, %v227_v27, 0.0 }
 0x12b   :  { %v244_v50 = vadd.f32 %v243_v32, %v242_v39  ;;  %v257_v39 = vsel %vm176_vm1, %v234_v15, 0.0 }
 0x12d   :  { %v1525_v19 = vpop.f32.mrf.mxu2 }
 0x12e   :  { %v235_v32 = vmul.f32 %v1525_v19, %v1525_v19 }
 0x12f   :  { %v1527_v20 = vpop.f32.mrf.mxu0 }
 0x130   :  { %v228_v30 = vmul.f32 %v1527_v20, %v1527_v20  ;;  %v180_v33 = vsel %vm176_vm1, %v1527_v20, 0.0 }
 0x131   :  { %v181_v51 = vadd.f32 %v180_v33, %v179_v36 }
 0x132   :  { %v245_v43 = vsel %vm176_vm1, %v228_v30, 0.0 }
 0x133   :  { %v246_v62 = vadd.f32 %v245_v43, %v244_v50  ;;  %v194_v43 = vsel %vm176_vm1, %v1525_v19, 0.0 }
 0x135   :  { %v1529_v21 = vpop.f32.mrf.mxu2 }
 0x137   :  { %v1531_v22 = vpop.f32.mrf.mxu0 }
 0x138   :  { %v229_v35 = vmul.f32 %v1531_v22, %v1531_v22  ;;  %v182_v44 = vsel %vm176_vm1, %v1531_v22, 0.0 }
 0x139   :  { %v183_v0 = vadd.f32 %v182_v44, %v181_v51  ;;  %v236_v44 = vmul.f32 %v1529_v21, %v1529_v21  ;;  %v259_v51 = vsel %vm176_vm1, %v235_v32, 0.0 }
 0x13a   :  { %v247_v56 = vsel %vm176_vm1, %v229_v35, 0.0 }
 0x13b   :  { %v248_v4 = vadd.f32 %v247_v56, %v246_v62  ;;  %v196_v56 = vsel %vm176_vm1, %v1529_v21, 0.0 }
 0x13d   :  { %v1533_v23 = vpop.f32.mrf.mxu2 }
 0x13f   :  { %v1535_v24 = vpop.f32.mrf.mxu0 }
 0x140   :  { %v230_v46 = vmul.f32 %v1535_v24, %v1535_v24  ;;  %v184_v57 = vsel %vm176_vm1, %v1535_v24, 0.0 }
 0x141   :  { %v185_v5 = vadd.f32 %v184_v57, %v183_v0  ;;  %v237_v57 = vmul.f32 %v1533_v23, %v1533_v23  ;;  %v261_v0 = vsel %vm176_vm1, %v236_v44, 0.0 }
 0x142   :  { %v249_v1 = vsel %vm176_vm1, %v230_v46, 0.0 }
 0x143   :  { %v250_v8 = vadd.f32 %v249_v1, %v248_v4  ;;  %v198_v1 = vsel %vm176_vm1, %v1533_v23, 0.0 }
 0x145   :  { %v1537_v25 = vpop.f32.mrf.mxu2 }
 0x147   :  { %v1539_v26 = vpop.f32.mrf.mxu0 }
 0x148   :  { %v231_v60 = vmul.f32 %v1539_v26, %v1539_v26  ;;  %v186_v2 = vsel %vm176_vm1, %v1539_v26, 0.0 }
 0x149   :  { %v187_v9 = vadd.f32 %v186_v2, %v185_v5  ;;  %v238_v2 = vmul.f32 %v1537_v25, %v1537_v25 }
 0x14a   :  { %v251_v6 = vsel %vm176_vm1, %v231_v60, 0.0 }
 0x14b   :  { %v252_v11 = vadd.f32 %v251_v6, %v250_v8  ;;  %v263_v6 = vsel %vm176_vm1, %v237_v57, 0.0 }
 0x14d   :  { %v1556_v37 = vpop.f32.mrf.mxu2 }
 0x14e   :  { %v239_v8 = vmul.f32 %v1556_v37, %v1556_v37 }
 0x14f   :  { %v1564_v54 = vpop.f32.mrf.mxu0 }
 0x150   :  { %v232_v3 = vmul.f32 %v1564_v54, %v1564_v54  ;;  %v188_v7 = vsel %vm176_vm1, %v1564_v54, 0.0 }
 0x151   :  { %v189_v12 = vadd.f32 %v188_v7, %v187_v9  ;;  %v200_v7 = vsel %vm176_vm1, %v1537_v25, 0.0 }
 0x152   :  { %v253_v10 = vsel %vm176_vm1, %v232_v3, 0.0 }
 0x153   :  { %v254_v29 = vadd.f32 %v253_v10, %v252_v11  ;;  %v265_v11 = vsel %vm176_vm1, %v238_v2, 0.0 }
 0x155   :  { %v1582_v14 = vpop.f32.mrf.mxu2 }
 0x156   :  { %v240_v15 = vmul.f32 %v1582_v14, %v1582_v14 }
 0x157   :  { %v1580_v13 = vpop.f32.mrf.mxu0 }
 0x158   :  { %v190_v27 = vsel %vm176_vm1, %v1580_v13, 0.0  ;;  %v233_v28 = vmul.f32 %v1580_v13, %v1580_v13 }
 0x159   :  { %v191_v30 = vadd.f32 %v190_v27, %v189_v12  ;;  %v202_v12 = vsel %vm176_vm1, %v1556_v37, 0.0 }
 0x15a   :  { %v255_v33 = vsel %vm176_vm1, %v233_v28, 0.0 }
 0x15b   :  { %v193_v35 = vadd.f32 %v192_v31, %v191_v30  ;;  %v256_v36 = vadd.f32 %v255_v33, %v254_v29  ;;  %v267_v30 = vsel %vm176_vm1, %v239_v8, 0.0  ;;  %v204_v31 = vsel %vm176_vm1, %v1582_v14, 0.0 }
 0x15d   :  { %v195_v46 = vadd.f32 %v194_v43, %v193_v35  ;;  %v258_v50 = vadd.f32 %v257_v39, %v256_v36  ;;  %v1610_v5 = vpop.f32.mrf.mxu2  ;;  %v269_v36 = vsel %vm176_vm1, %v240_v15, 0.0 }
 0x15e   :  { %v241_v27 = vmul.f32 %v1610_v5, %v1610_v5  ;;  %v206_v32 = vsel %vm176_vm1, %v1610_v5, 0.0 }
 0x15f   :  { %v197_v60 = vadd.f32 %v196_v56, %v195_v46  ;;  %v260_v62 = vadd.f32 %v259_v51, %v258_v50 }
 0x160   :  { %v271_v39 = vsel %vm176_vm1, %v241_v27, 0.0 }
 0x161   :  { %v262_v3 = vadd.f32 %v261_v0, %v260_v62  ;;  %v199_v4 = vadd.f32 %v198_v1, %v197_v60 }
 0x163   :  { %v201_v9 = vadd.f32 %v200_v7, %v199_v4  ;;  %v264_v10 = vadd.f32 %v263_v6, %v262_v3 }
 0x165   :  { %v203_v28 = vadd.f32 %v202_v12, %v201_v9  ;;  %v266_v29 = vadd.f32 %v265_v11, %v264_v10  ;;  %v1321_v9 = vmov 128.0  }
 0x166   :  { %1233 = vrcp.f32 %v1321_v9 }
 0x167   :  { %v205_v33 = vadd.f32 %v204_v31, %v203_v28  ;;  %v268_v35 = vadd.f32 %v267_v30, %v266_v29 }
 0x169   :  { %v207_v43 = vadd.f32 %v206_v32, %v205_v33  ;;  %v270_v44 = vadd.f32 %v269_v36, %v268_v35 }
 0x16b   :  { %208 = vadd.xlane.f32.xlu1 %v207_v43  ;;  %v272_v46 = vadd.f32 %v271_v39, %v270_v44 }
 0x16c   :  { %v1234_v10 = vpop.eup %1233 }
 0x16d   :  { %273 = vadd.xlane.f32.xlu2 %v272_v46  ;;  %v219_v11 = vmul.f32 128.0, %v1234_v10  ;;  %vm223_vm2 = vweird.f32 %v1234_v10 }
 0x16f   :  { %v220_v12 = vsub.f32 1.0, %v219_v11 }
 0x171   :  { %v221_v15 = vmul.f32 %v1234_v10, %v220_v12 }
 0x173   :  { %v222_v27 = vadd.f32 %v1234_v10, %v221_v15 }
 0x175   :  { %v1631_v28 = vsel %vm223_vm2, %v1234_v10, %v222_v27 }
 0x1de   :  { %v209_v50 = vpop.xlane.xlu1 %208 }
 0x1df   :  { %v210_v51 = vrot.slane %v209_v50, 4 }
 0x1e0   :  { %v274_v56 = vpop.xlane.xlu2 %273 }
 0x1e1   :  { %v211_v57 = vadd.f32 %v210_v51, %v209_v50  ;;  %v275_v60 = vrot.slane %v274_v56, 4 }
 0x1e3   :  { %v212_v62 = vrot.slane %v211_v57, 2  ;;  %v276_v0 = vadd.f32 %v275_v60, %v274_v56 }
 0x1e5   :  { %v277_v1 = vrot.slane %v276_v0, 2  ;;  %v213_v2 = vadd.f32 %v212_v62, %v211_v57 }
 0x1e7   :  { %v214_v3 = vrot.slane %v213_v2, 1  ;;  %v278_v4 = vadd.f32 %v277_v1, %v276_v0 }
 0x1e9   :  { %v215_v6 = vadd.f32 %v214_v3, %v213_v2  ;;  %v279_v7 = vrot.slane %v278_v4, 1 }
 0x1eb   :  { %1216 = vpush %v215_v6  ;;  %v280_v8 = vadd.f32 %v279_v7, %v278_v4 }
 0x1ed   :  { %1218 = vpush %v280_v8 }
 0x21c   :  { %s1217_s1 = spop %1216 }
 0x21d   :  { %v217_v29 = vstv %s1217_s1 }
 0x21e   :  { %v1634_v30 = vmul.f32 %v1631_v28, %v217_v29  ;;  %s1219_s22 = spop %1218 }
 0x21f   :  { %v282_v31 = vstv %s1219_s22 }
 0x220   :  { %v283_v32 = vmul.f32 %v282_v31, %v1631_v28  ;;  %v284_v33 = vmul.f32 %v1634_v30, %v1634_v30  ;;  %v301_v56 = vsub.f32 %v1610_v5, %v1634_v30  ;;  %v300_v57 = vsub.f32 %v1582_v14, %v1634_v30 }
 0x221   :  { %v299_v1 = vsub.f32 %v1556_v37, %v1634_v30  ;;  %v298_v4 = vsub.f32 %v1537_v25, %v1634_v30  ;;  %v297_v6 = vsub.f32 %v1533_v23, %v1634_v30  ;;  %v296_v25 = vsub.f32 %v1529_v21, %v1634_v30 }
 0x222   :  { %v285_v35 = vsub.f32 %v283_v32, %v284_v33  ;;  %v295_v23 = vsub.f32 %v1525_v19, %v1634_v30  ;;  %v294_v21 = vsub.f32 %v1521_v17, %v1634_v30  ;;  %v293_v19 = vsub.f32 %v1580_v13, %v1634_v30 }
 0x223   :  { %v292_v17 = vsub.f32 %v1564_v54, %v1634_v30  ;;  %v291_v13 = vsub.f32 %v1539_v26, %v1634_v30  ;;  %v290_v54 = vsub.f32 %v1535_v24, %v1634_v30  ;;  %v289_v26 = vsub.f32 %v1531_v22, %v1634_v30 }
 0x224   :  { %v302_v36 = vadd.f32 1e-05, %v285_v35  ;;  %v288_v24 = vsub.f32 %v1527_v20, %v1634_v30  ;;  %v287_v22 = vsub.f32 %v1523_v18, %v1634_v30  ;;  %v286_v20 = vsub.f32 %v1519_v16, %v1634_v30  ;;  %v345_v16 = vld [vmem:[%s2517_s2] sm:$0xff] }
 0x225   :  { %v353_v30 = vld [vmem:[%s2517_s2 + $0x40] sm:$0xff] }
 0x226   :  { %1235 = vrsqrt.f32 %v302_v36  ;;  %vm309_vm4 = vweird.f32 %v302_v36 }
 0x22c   :  { %v1236_v39 = vpop.eup %1235 }
 0x22d   :  { %v304_v43 = vmul.f32 %v1236_v39, %v302_v36  ;;  %vm310_vm3 = vweird.f32 %v1236_v39 }
 0x22e   :  { %vm311_vm5 = vmor %vm309_vm4, %vm310_vm3 }
 0x22f   :  { %v305_v44 = vmul.f32 %v1236_v39, %v304_v43 }
 0x231   :  { %v306_v46 = vmul.f32 0.5, %v305_v44 }
 0x233   :  { %v307_v50 = vsub.f32 1.5, %v306_v46 }
 0x235   :  { %v308_v51 = vmul.f32 %v1236_v39, %v307_v50 }
 0x237   :  { %v1643_v60 = vsel %vm311_vm5, %v1236_v39, %v308_v51 }
 0x238   :  { %v328_v62 = vmul.f32 %v1643_v60, %v301_v56  ;;  %v327_v0 = vmul.f32 %v1643_v60, %v300_v57  ;;  %v326_v3 = vmul.f32 %v1643_v60, %v299_v1  ;;  %v325_v5 = vmul.f32 %v1643_v60, %v298_v4  ;;  %v354_v1 = vld [vmem:[%s2517_s2 + $0x48] sm:$0xff]  ;;  %v355_v4 = vld [vmem:[%s2517_s2 + $0x50] sm:$0xff] }
 0x239   :  { %v324_v7 = vmul.f32 %v1643_v60, %v297_v6  ;;  %v323_v9 = vmul.f32 %v1643_v60, %v296_v25  ;;  %v322_v11 = vmul.f32 %v1643_v60, %v295_v23  ;;  %v321_v15 = vmul.f32 %v1643_v60, %v294_v21  ;;  %v356_v6 = vld [vmem:[%s2517_s2 + $0x58] sm:$0xff]  ;;  %v357_v25 = vld [vmem:[%s2517_s2 + $0x60] sm:$0xff]  ;;  %v358_v23 = vld [vmem:[%s2517_s2 + $0x68] sm:$0xff] }
 0x23a   :  { %v1649_v2 = vmax.f32 %v328_v62, 0.0  ;;  %v1656_v14 = vmax.f32 %v327_v0, 0.0  ;;  %v1663_v37 = vmax.f32 %v326_v3, 0.0  ;;  %v1670_v8 = vmax.f32 %v325_v5, 0.0  ;;  %v347_v3 = vld [vmem:[%s2517_s2 + $0x10] sm:$0xff]  ;;  %v348_v5 = vld [vmem:[%s2517_s2 + $0x18] sm:$0xff] }
 0x23b   :  { %v1677_v10 = vmax.f32 %v324_v7, 0.0  ;;  %v1684_v12 = vmax.f32 %v323_v9, 0.0  ;;  %v1691_v27 = vmax.f32 %v322_v11, 0.0  ;;  %v320_v29 = vmul.f32 %v1643_v60, %v293_v19  ;;  %v349_v7 = vld [vmem:[%s2517_s2 + $0x20] sm:$0xff]  ;;  %v350_v9 = vld [vmem:[%s2517_s2 + $0x28] sm:$0xff]  ;;  %v351_v11 = vld [vmem:[%s2517_s2 + $0x30] sm:$0xff] }
 0x23c   :  { %2532 = vst [vmem:[#allocation7_spill] sm:$0xff] %v1649_v2  ;;  %361 = vmatpush.msra.mxu1 %v1649_v2  ;;  %1200 = vmatpush.msra.mxu3 %v1649_v2  ;;  %v1698_v31 = vmax.f32 %v321_v15, 0.0  ;;  %v319_v32 = vmul.f32 %v1643_v60, %v292_v17  ;;  %v318_v35 = vmul.f32 %v1643_v60, %v291_v13  ;;  %v359_v21 = vld [vmem:[%s2517_s2 + $0x70] sm:$0xff]  ;;  %v352_v15 = vld [vmem:[%s2517_s2 + $0x38] sm:$0xff] }
 0x23d   :  { %2533 = vst [vmem:[#allocation8_spill] sm:$0xff] %v1656_v14  ;;  %v1705_v33 = vmax.f32 %v320_v29, 0.0  ;;  %v317_v39 = vmul.f32 %v1643_v60, %v290_v54  ;;  %v316_v44 = vmul.f32 %v1643_v60, %v289_v26  ;;  %v315_v50 = vmul.f32 %v1643_v60, %v288_v24  ;;  %v360_v19 = vld [vmem:[%s2517_s2 + $0x78] sm:$0xff] }
 0x23e   :  { %362 = vmatpush.msra.mxu1 %v1656_v14  ;;  %1201 = vmatpush.msra.mxu3 %v1656_v14  ;;  %2534 = vst [vmem:[#allocation9_spill] sm:$0xff] %v1663_v37  ;;  %v1712_v36 = vmax.f32 %v319_v32, 0.0  ;;  %v1719_v43 = vmax.f32 %v318_v35, 0.0  ;;  %v314_v56 = vmul.f32 %v1643_v60, %v287_v22  ;;  %v313_v62 = vmul.f32 %v1643_v60, %v286_v20  ;;  %v346_v60 = vld [vmem:[%s2517_s2 + $0x8] sm:$0xff] }
 0x23f   :  { %v1726_v46 = vmax.f32 %v317_v39, 0.0  ;;  %v1733_v51 = vmax.f32 %v316_v44, 0.0  ;;  %v1740_v57 = vmax.f32 %v315_v50, 0.0 }
 0x240   :  { %363 = vmatpush.msra.mxu1 %v1663_v37  ;;  %1202 = vmatpush.msra.mxu3 %v1663_v37  ;;  %v1745_v18 = vmax.f32 %v314_v56, 0.0  ;;  %v1749_v0 = vmax.f32 %v313_v62, 0.0 }
 0x242   :  { %364 = vmatpush.msra.mxu1 %v1670_v8  ;;  %1203 = vmatpush.msra.mxu3 %v1670_v8 }
 0x244   :  { %365 = vmatpush.msra.mxu1 %v1677_v10  ;;  %1204 = vmatpush.msra.mxu3 %v1677_v10 }
 0x246   :  { %366 = vmatpush.msra.mxu1 %v1684_v12  ;;  %1205 = vmatpush.msra.mxu3 %v1684_v12 }
 0x248   :  { %367 = vmatpush.msra.mxu1 %v1691_v27  ;;  %1206 = vmatpush.msra.mxu3 %v1691_v27 }
 0x24a   :  { %368 = vmatpush.msra.mxu1 %v1698_v31  ;;  %1207 = vmatpush.msra.mxu3 %v1698_v31 }
 0x24c   :  { %369 = vmatpush.msra.mxu1 %v1705_v33  ;;  %1208 = vmatpush.msra.mxu3 %v1705_v33 }
 0x24e   :  { %370 = vmatpush.msra.mxu1 %v1712_v36  ;;  %1209 = vmatpush.msra.mxu3 %v1712_v36 }
 0x250   :  { %371 = vmatpush.msra.mxu1 %v1719_v43  ;;  %1210 = vmatpush.msra.mxu3 %v1719_v43 }
 0x252   :  { %372 = vmatpush.msra.mxu1 %v1726_v46  ;;  %1211 = vmatpush.msra.mxu3 %v1726_v46 }
 0x254   :  { %373 = vmatpush.msra.mxu1 %v1733_v51  ;;  %1212 = vmatpush.msra.mxu3 %v1733_v51 }
 0x256   :  { %374 = vmatpush.msra.mxu1 %v1740_v57  ;;  %1213 = vmatpush.msra.mxu3 %v1740_v57 }
 0x258   :  { %375 = vmatpush.msra.mxu1 %v1745_v18  ;;  %1214 = vmatpush.msra.mxu3 %v1745_v18 }
 0x25a   :  { %376 = vmatpush.msra.mxu1 %v1749_v0  ;;  %1215 = vmatpush.msra.mxu3 %v1749_v0 }
 0x25b   :  { %377 = vmatmul.f32.vlgmr.msra.gmra.mxu1 %v345_v16  ;;  %401 = vmatmul.f32.vlgmr.msra.gmra.mxu3 %v353_v30 }
 0x263   :  { %380 = vmatmul.f32.gmra.mxu1 %v346_v60  ;;  %404 = vmatmul.f32.gmra.mxu3 %v354_v1 }
 0x26b   :  { %383 = vmatmul.f32.gmra.mxu1 %v347_v3  ;;  %407 = vmatmul.f32.gmra.mxu3 %v355_v4 }
 0x273   :  { %386 = vmatmul.f32.gmra.mxu1 %v348_v5  ;;  %410 = vmatmul.f32.gmra.mxu3 %v356_v6 }
 0x27b   :  { %389 = vmatmul.f32.gmra.mxu1 %v349_v7  ;;  %413 = vmatmul.f32.gmra.mxu3 %v357_v25 }
 0x283   :  { %392 = vmatmul.f32.gmra.mxu1 %v350_v9  ;;  %416 = vmatmul.f32.gmra.mxu3 %v358_v23 }
 0x28b   :  { %395 = vmatmul.f32.gmra.mxu1 %v351_v11  ;;  %419 = vmatmul.f32.gmra.mxu3 %v359_v21 }
 0x293   :  { %398 = vmatmul.f32.gmra.mxu1 %v352_v15  ;;  %422 = vmatmul.f32.gmra.mxu3 %v360_v19 }
 0x2d8   :  { %v1801_v29 = vpop.f32.mrf.mxu1 }
 0x2d9   :  { %v468_v56 = vmul.f32 %v1801_v29, %v1801_v29  ;;  %v426_v16 = vsel %vm176_vm1, %v1801_v29, 0.0 }
 0x2db   :  { %v484_v5 = vsel %vm176_vm1, %v468_v56, 0.0 }
 0x2de   :  { %v1803_v17 = vpop.f32.mrf.mxu3 }
 0x2df   :  { %v476_v38 = vmul.f32 %v1803_v17, %v1803_v17 }
 0x2e0   :  { %v1805_v32 = vpop.f32.mrf.mxu1 }
 0x2e1   :  { %v469_v22 = vmul.f32 %v1805_v32, %v1805_v32  ;;  %v427_v20 = vsel %vm176_vm1, %v1805_v32, 0.0 }
 0x2e2   :  { %v428_v3 = vadd.f32 %v427_v20, %v426_v16 }
 0x2e3   :  { %v485_v30 = vsel %vm176_vm1, %v469_v22, 0.0 }
 0x2e4   :  { %v486_v9 = vadd.f32 %v485_v30, %v484_v5 }
 0x2e6   :  { %v1807_v13 = vpop.f32.mrf.mxu3 }
 0x2e8   :  { %v1809_v35 = vpop.f32.mrf.mxu1 }
 0x2e9   :  { %v470_v62 = vmul.f32 %v1809_v35, %v1809_v35  ;;  %v429_v60 = vsel %vm176_vm1, %v1809_v35, 0.0 }
 0x2ea   :  { %v430_v23 = vadd.f32 %v429_v60, %v428_v3 }
 0x2eb   :  { %v487_v6 = vsel %vm176_vm1, %v470_v62, 0.0 }
 0x2ec   :  { %v488_v22 = vadd.f32 %v487_v6, %v486_v9 }
 0x2ee   :  { %v1811_v54 = vpop.f32.mrf.mxu3 }
 0x2f0   :  { %v1813_v39 = vpop.f32.mrf.mxu1 }
 0x2f1   :  { %v471_v1 = vmul.f32 %v1813_v39, %v1813_v39  ;;  %v431_v7 = vsel %vm176_vm1, %v1813_v39, 0.0 }
 0x2f2   :  { %v432_v56 = vadd.f32 %v431_v7, %v430_v23 }
 0x2f3   :  { %v489_v21 = vsel %vm176_vm1, %v471_v1, 0.0 }
 0x2f4   :  { %v490_v30 = vadd.f32 %v489_v21, %v488_v22 }
 0x2f6   :  { %v1815_v26 = vpop.f32.mrf.mxu3 }
 0x2f8   :  { %v1817_v44 = vpop.f32.mrf.mxu1 }
 0x2f9   :  { %v472_v25 = vmul.f32 %v1817_v44, %v1817_v44  ;;  %v433_v15 = vsel %vm176_vm1, %v1817_v44, 0.0 }
 0x2fa   :  { %v434_v60 = vadd.f32 %v433_v15, %v432_v56  ;;  %v441_v56 = vsel %vm176_vm1, %v1803_v17, 0.0 }
 0x2fb   :  { %v491_v20 = vsel %vm176_vm1, %v472_v25, 0.0 }
 0x2fc   :  { %v492_v5 = vadd.f32 %v491_v20, %v490_v30  ;;  %v499_v30 = vsel %vm176_vm1, %v476_v38, 0.0 }
 0x2fe   :  { %v1819_v24 = vpop.f32.mrf.mxu3 }
 0x300   :  { %v1821_v50 = vpop.f32.mrf.mxu1 }
 0x301   :  { %v473_v19 = vmul.f32 %v1821_v50, %v1821_v50  ;;  %v435_v62 = vsel %vm176_vm1, %v1821_v50, 0.0 }
 0x302   :  { %v436_v34 = vadd.f32 %v435_v62, %v434_v60  ;;  %v443_v60 = vsel %vm176_vm1, %v1807_v13, 0.0 }
 0x303   :  { %v493_v1 = vsel %vm176_vm1, %v473_v19, 0.0 }
 0x304   :  { %v494_v7 = vadd.f32 %v493_v1, %v492_v5  ;;  %v478_v1 = vmul.f32 %v1811_v54, %v1811_v54 }
 0x306   :  { %v1838_v4 = vpop.f32.mrf.mxu3  ;;  %v503_v38 = vsel %vm176_vm1, %v478_v1, 0.0 }
 0x308   :  { %v1846_v11 = vpop.f32.mrf.mxu1 }
 0x309   :  { %v474_v16 = vmul.f32 %v1846_v11, %v1846_v11  ;;  %v437_v3 = vsel %vm176_vm1, %v1846_v11, 0.0 }
 0x30a   :  { %v438_v9 = vadd.f32 %v437_v3, %v436_v34  ;;  %v477_v34 = vmul.f32 %v1807_v13, %v1807_v13 }
 0x30b   :  { %v495_v6 = vsel %vm176_vm1, %v474_v16, 0.0 }
 0x30c   :  { %v496_v19 = vadd.f32 %v495_v6, %v494_v7  ;;  %v501_v6 = vsel %vm176_vm1, %v477_v34, 0.0  ;;  %v445_v7 = vsel %vm176_vm1, %v1811_v54, 0.0 }
 0x30e   :  { %v1864_v23 = vpop.f32.mrf.mxu3 }
 0x310   :  { %v1862_v25 = vpop.f32.mrf.mxu1 }
 0x311   :  { %v439_v21 = vsel %vm176_vm1, %v1862_v25, 0.0  ;;  %v475_v15 = vmul.f32 %v1862_v25, %v1862_v25 }
 0x312   :  { %v440_v22 = vadd.f32 %v439_v21, %v438_v9  ;;  %v479_v9 = vmul.f32 %v1815_v26, %v1815_v26 }
 0x313   :  { %v497_v20 = vsel %vm176_vm1, %v475_v15, 0.0 }
 0x314   :  { %v442_v62 = vadd.f32 %v441_v56, %v440_v22  ;;  %v498_v16 = vadd.f32 %v497_v20, %v496_v19  ;;  %v447_v19 = vsel %vm176_vm1, %v1815_v26, 0.0  ;;  %v480_v22 = vmul.f32 %v1819_v24, %v1819_v24 }
 0x315   :  { %v505_v34 = vsel %vm176_vm1, %v479_v9, 0.0 }
 0x316   :  { %v444_v3 = vadd.f32 %v443_v60, %v442_v62  ;;  %v500_v5 = vadd.f32 %v499_v30, %v498_v16  ;;  %v1892_v62 = vpop.f32.mrf.mxu3  ;;  %v449_v16 = vsel %vm176_vm1, %v1819_v24, 0.0  ;;  %v481_v30 = vmul.f32 %v1838_v4, %v1838_v4 }
 0x318   :  { %v446_v21 = vadd.f32 %v445_v7, %v444_v3  ;;  %v502_v15 = vadd.f32 %v501_v6, %v500_v5  ;;  %v507_v3 = vsel %vm176_vm1, %v480_v22, 0.0  ;;  %v451_v5 = vsel %vm176_vm1, %v1838_v4, 0.0 }
 0x319   :  { %v482_v6 = vmul.f32 %v1864_v23, %v1864_v23  ;;  %v483_v7 = vmul.f32 %v1892_v62, %v1892_v62 }
 0x31a   :  { %v504_v56 = vadd.f32 %v503_v38, %v502_v15  ;;  %v448_v20 = vadd.f32 %v447_v19, %v446_v21  ;;  %v509_v15 = vsel %vm176_vm1, %v481_v30, 0.0  ;;  %v453_v38 = vsel %vm176_vm1, %v1864_v23, 0.0 }
 0x31b   :  { %v455_v19 = vsel %vm176_vm1, %v1892_v62, 0.0 }
 0x31c   :  { %v450_v60 = vadd.f32 %v449_v16, %v448_v20  ;;  %v506_v1 = vadd.f32 %v505_v34, %v504_v56  ;;  %v511_v20 = vsel %vm176_vm1, %v482_v6, 0.0  ;;  %v513_v34 = vsel %vm176_vm1, %v483_v7, 0.0 }
 0x31e   :  { %v452_v9 = vadd.f32 %v451_v5, %v450_v60  ;;  %v508_v21 = vadd.f32 %v507_v3, %v506_v1 }
 0x320   :  { %v454_v22 = vadd.f32 %v453_v38, %v452_v9  ;;  %v510_v56 = vadd.f32 %v509_v15, %v508_v21 }
 0x322   :  { %v456_v16 = vadd.f32 %v455_v19, %v454_v22  ;;  %v512_v40 = vadd.f32 %v511_v20, %v510_v56 }
 0x324   :  { %457 = vadd.xlane.f32.xlu0 %v456_v16  ;;  %v514_v2 = vadd.f32 %v513_v34, %v512_v40 }
 0x326   :  { %515 = vadd.xlane.f32.xlu1 %v514_v2 }
 0x397   :  { %v458_v60 = vpop.xlane.xlu0 %457 }
 0x398   :  { %v459_v1 = vrot.slane %v458_v60, 4 }
 0x399   :  { %v516_v30 = vpop.xlane.xlu1 %515 }
 0x39a   :  { %v460_v3 = vadd.f32 %v459_v1, %v458_v60  ;;  %v517_v5 = vrot.slane %v516_v30, 4 }
 0x39c   :  { %v461_v41 = vrot.slane %v460_v3, 2  ;;  %v518_v14 = vadd.f32 %v517_v5, %v516_v30 }
 0x39e   :  { %v519_v42 = vrot.slane %v518_v14, 2  ;;  %v462_v37 = vadd.f32 %v461_v41, %v460_v3 }
 0x3a0   :  { %v463_v9 = vrot.slane %v462_v37, 1  ;;  %v520_v21 = vadd.f32 %v519_v42, %v518_v14 }
 0x3a2   :  { %v464_v15 = vadd.f32 %v463_v9, %v462_v37  ;;  %v521_v6 = vrot.slane %v520_v21, 1 }
 0x3a4   :  { %1220 = vpush %v464_v15  ;;  %v522_v7 = vadd.f32 %v521_v6, %v520_v21 }
 0x3a6   :  { %1222 = vpush %v522_v7 }
 0x3d5   :  { %s1221_s2 = spop %1220 }
 0x3d6   :  { %v466_v38 = vstv %s1221_s2 }
 0x3d7   :  { %v1914_v40 = vmul.f32 %v466_v38, %v1631_v28  ;;  %s1223_s27 = spop %1222 }
 0x3d8   :  { %v524_v2 = vstv %s1223_s27 }
 0x3d9   :  { %v525_v19 = vmul.f32 %v524_v2, %v1631_v28  ;;  %v526_v22 = vmul.f32 %v1914_v40, %v1914_v40  ;;  %v528_v60 = vsub.f32 %v1801_v29, %v1914_v40  ;;  %v529_v1 = vsub.f32 %v1805_v32, %v1914_v40 }
 0x3da   :  { %v530_v3 = vsub.f32 %v1809_v35, %v1914_v40  ;;  %v531_v21 = vsub.f32 %v1813_v39, %v1914_v40  ;;  %v532_v29 = vsub.f32 %v1817_v44, %v1914_v40  ;;  %v533_v38 = vsub.f32 %v1821_v50, %v1914_v40 }
 0x3db   :  { %v527_v41 = vsub.f32 %v525_v19, %v526_v22  ;;  %v534_v19 = vsub.f32 %v1846_v11, %v1914_v40 }
 0x3dd   :  { %v544_v56 = vadd.f32 1e-05, %v527_v41 }
 0x3df   :  { %1237 = vrsqrt.f32 %v544_v56  ;;  %vm551_vm7 = vweird.f32 %v544_v56 }
 0x3e5   :  { %v1238_v42 = vpop.eup %1237 }
 0x3e6   :  { %v546_v14 = vmul.f32 %v1238_v42, %v544_v56  ;;  %vm552_vm6 = vweird.f32 %v1238_v42  ;;  %v535_v56 = vsub.f32 %v1862_v25, %v1914_v40  ;;  %v537_v25 = vsub.f32 %v1807_v13, %v1914_v40 }
 0x3e7   :  { %vm553_vm8 = vmor %vm551_vm7, %vm552_vm6  ;;  %v541_v13 = vsub.f32 %v1838_v4, %v1914_v40  ;;  %v543_v4 = vsub.f32 %v1892_v62, %v1914_v40 }
 0x3e8   :  { %v547_v37 = vmul.f32 %v1238_v42, %v546_v14 }
 0x3ea   :  { %v548_v20 = vmul.f32 0.5, %v547_v37  ;;  %v536_v37 = vsub.f32 %v1803_v17, %v1914_v40  ;;  %v539_v17 = vsub.f32 %v1815_v26, %v1914_v40 }
 0x3ec   :  { %v549_v34 = vsub.f32 1.5, %v548_v20 }
 0x3ee   :  { %v550_v16 = vmul.f32 %v1238_v42, %v549_v34 }
 0x3f0   :  { %v1923_v30 = vsel %vm553_vm8, %v1238_v42, %v550_v16 }
 0x3f1   :  { %v555_v5 = vmul.f32 %v1923_v30, %v528_v60  ;;  %v556_v9 = vmul.f32 %v1923_v30, %v529_v1  ;;  %v557_v15 = vmul.f32 %v1923_v30, %v530_v3  ;;  %v558_v6 = vmul.f32 %v1923_v30, %v531_v21 }
 0x3f2   :  { %v559_v35 = vmul.f32 %v1923_v30, %v532_v29  ;;  %v560_v39 = vmul.f32 %v1923_v30, %v533_v38  ;;  %v561_v42 = vmul.f32 %v1923_v30, %v534_v19  ;;  %v562_v11 = vmul.f32 %v1923_v30, %v535_v56 }
 0x3f3   :  { %v571_v32 = vmax.f32 %v555_v5, 0.0  ;;  %v572_v7 = vmax.f32 %v556_v9, 0.0  ;;  %v573_v2 = vmax.f32 %v557_v15, 0.0  ;;  %v574_v22 = vmax.f32 %v558_v6, 0.0 }
 0x3f4   :  { %v575_v14 = vmax.f32 %v559_v35, 0.0  ;;  %v576_v20 = vmax.f32 %v560_v39, 0.0  ;;  %v563_v16 = vmul.f32 %v1923_v30, %v536_v37  ;;  %v577_v60 = vmax.f32 %v561_v42, 0.0 }
 0x3f5   :  { %v587_v41 = vadd.f32 %v571_v32, %v1749_v0  ;;  %v588_v44 = vadd.f32 %v572_v7, %v1745_v18  ;;  %v589_v50 = vadd.f32 %v573_v2, %v1740_v57  ;;  %v590_v34 = vadd.f32 %v574_v22, %v1733_v51 }
 0x3f6   :  { %v538_v57 = vsub.f32 %v1811_v54, %v1914_v40  ;;  %v591_v51 = vadd.f32 %v575_v14, %v1726_v46  ;;  %v564_v1 = vmul.f32 %v1923_v30, %v537_v25  ;;  %v578_v54 = vmax.f32 %v562_v11, 0.0 }
 0x3f7   :  { %v1952_v0 = vadd.f32 %v587_v41, %v1467_v63  ;;  %v1955_v18 = vadd.f32 %v588_v44, %v1461_v61  ;;  %v1966_v63 = vadd.f32 %v589_v50, %v1457_v59  ;;  %v540_v61 = vsub.f32 %v1819_v24, %v1914_v40 }
 0x3f8   :  { %v592_v3 = vadd.f32 %v576_v20, %v1719_v43  ;;  %v1975_v26 = vadd.f32 %v590_v34, %v1455_v58  ;;  %v542_v24 = vsub.f32 %v1864_v23, %v1914_v40  ;;  %v565_v5 = vmul.f32 %v1923_v30, %v538_v57 }
 0x3f9   :  { %v619_v46 = vsel %vm176_vm1, %v1952_v0, 0.0  ;;  %v620_v59 = vsel %vm176_vm1, %v1955_v18, 0.0  ;;  %v579_v21 = vmax.f32 %v563_v16, 0.0  ;;  %v593_v43 = vadd.f32 %v577_v60, %v1712_v36 }
 0x3fa   :  { %v621_v9 = vadd.f32 %v620_v59, %v619_v46  ;;  %v1988_v58 = vadd.f32 %v591_v51, %v1449_v55  ;;  %v622_v15 = vsel %vm176_vm1, %v1966_v63, 0.0  ;;  %v566_v29 = vmul.f32 %v1923_v30, %v539_v17 }
 0x3fb   :  { %v567_v6 = vmul.f32 %v1923_v30, %v540_v61  ;;  %v568_v23 = vmul.f32 %v1923_v30, %v541_v13  ;;  %v580_v62 = vmax.f32 %v564_v1, 0.0  ;;  %v594_v40 = vadd.f32 %v578_v54, %v1705_v33 }
 0x3fc   :  { %v623_v32 = vadd.f32 %v622_v15, %v621_v9  ;;  %v1997_v7 = vadd.f32 %v592_v3, %v1445_v53  ;;  %v624_v55 = vsel %vm176_vm1, %v1975_v26, 0.0  ;;  %v569_v36 = vmul.f32 %v1923_v30, %v542_v24  ;;  %v2535_v9 = vld [vmem:[#allocation9_spill] sm:$0xff] }
 0x3fd   :  { %v661_v35 = vmul.f32 %v1952_v0, %v1952_v0  ;;  %v662_v2 = vmul.f32 %v1955_v18, %v1955_v18  ;;  %v581_v19 = vmax.f32 %v565_v5, 0.0  ;;  %v595_v39 = vadd.f32 %v579_v21, %v1698_v31 }
 0x3fe   :  { %v625_v38 = vadd.f32 %v624_v55, %v623_v32  ;;  %v2008_v33 = vadd.f32 %v593_v43, %v1441_v52  ;;  %v626_v53 = vsel %vm176_vm1, %v1988_v58, 0.0  ;;  %v570_v22 = vmul.f32 %v1923_v30, %v543_v4  ;;  %v2536_v43 = vld [vmem:[#allocation6_spill] sm:$0xff]  ;;  %v2537_v32 = vld [vmem:[#allocation8_spill] sm:$0xff] }
 0x3ff   :  { %v582_v41 = vmax.f32 %v566_v29, 0.0  ;;  %v663_v56 = vmul.f32 %v1966_v63, %v1966_v63  ;;  %v583_v42 = vmax.f32 %v567_v6, 0.0  ;;  %v596_v14 = vadd.f32 %v580_v62, %v1691_v27 }
 0x400   :  { %v627_v44 = vadd.f32 %v626_v53, %v625_v38  ;;  %v2017_v50 = vadd.f32 %v594_v40, %v1437_v49  ;;  %v628_v52 = vsel %vm176_vm1, %v1997_v7, 0.0  ;;  %v664_v37 = vmul.f32 %v1975_v26, %v1975_v26  ;;  %v2538_v40 = vld [vmem:[#allocation5_spill] sm:$0xff] }
 0x401   :  { %v677_v30 = vsel %vm176_vm1, %v661_v35, 0.0  ;;  %v678_v11 = vsel %vm176_vm1, %v662_v2, 0.0  ;;  %v597_v20 = vadd.f32 %v581_v19, %v1684_v12  ;;  %v2027_v34 = vadd.f32 %v595_v39, %v1433_v48  ;;  %v2539_v39 = vld [vmem:[#allocation7_spill] sm:$0xff] }
 0x402   :  { %v629_v31 = vadd.f32 %v628_v52, %v627_v44  ;;  %v630_v49 = vsel %vm176_vm1, %v2008_v33, 0.0  ;;  %v679_v27 = vadd.f32 %v678_v11, %v677_v30  ;;  %v584_v25 = vmax.f32 %v568_v23, 0.0 }
 0x403   :  { %v665_v17 = vmul.f32 %v1988_v58, %v1988_v58  ;;  %v680_v16 = vsel %vm176_vm1, %v663_v56, 0.0  ;;  %v598_v60 = vadd.f32 %v582_v41, %v1677_v10  ;;  %v2036_v51 = vadd.f32 %v596_v14, %v1429_v47 }
 0x404   :  { %v631_v57 = vadd.f32 %v630_v49, %v629_v31  ;;  %v632_v48 = vsel %vm176_vm1, %v2017_v50, 0.0  ;;  %v681_v12 = vadd.f32 %v680_v16, %v679_v27  ;;  %v585_v61 = vmax.f32 %v569_v36, 0.0  ;;  %v2541_v31 = vld [vmem:[#allocation3_spill] sm:$0xff] }
 0x405   :  { %v666_v1 = vmul.f32 %v1997_v7, %v1997_v7  ;;  %v682_v54 = vsel %vm176_vm1, %v664_v37, 0.0  ;;  %v599_v3 = vadd.f32 %v583_v42, %v1670_v8  ;;  %v2045_v46 = vadd.f32 %v597_v20, %v1425_v45 }
 0x406   :  { %v633_v13 = vadd.f32 %v632_v48, %v631_v57  ;;  %v634_v47 = vsel %vm176_vm1, %v2027_v34, 0.0  ;;  %v683_v10 = vadd.f32 %v682_v54, %v681_v12  ;;  %v586_v59 = vmax.f32 %v570_v22, 0.0  ;;  %v2540_v22 = vld [vmem:[#allocation4_spill] sm:$0xff] }
 0x407   :  { %v667_v4 = vmul.f32 %v2008_v33, %v2008_v33  ;;  %v684_v5 = vsel %vm176_vm1, %v665_v17, 0.0  ;;  %v600_v21 = vadd.f32 %v584_v25, %v2535_v9  ;;  %v2054_v15 = vadd.f32 %v598_v60, %v2536_v43  ;;  %v2542_v25 = vld [vmem:[#allocation2_spill] sm:$0xff] }
 0x408   :  { %v635_v24 = vadd.f32 %v634_v47, %v633_v13  ;;  %v636_v45 = vsel %vm176_vm1, %v2036_v51, 0.0  ;;  %v685_v8 = vadd.f32 %v684_v5, %v683_v10  ;;  %v668_v6 = vmul.f32 %v2017_v50, %v2017_v50 }
 0x409   :  { %v686_v23 = vsel %vm176_vm1, %v666_v1, 0.0  ;;  %v601_v62 = vadd.f32 %v585_v61, %v2537_v32  ;;  %v2063_v55 = vadd.f32 %v599_v3, %v2538_v40  ;;  %v638_v36 = vsel %vm176_vm1, %v2045_v46, 0.0 }
 0x40a   :  { %v637_v29 = vadd.f32 %v636_v45, %v635_v24  ;;  %v687_v38 = vadd.f32 %v686_v23, %v685_v8  ;;  %v669_v2 = vmul.f32 %v2027_v34, %v2027_v34  ;;  %v688_v19 = vsel %vm176_vm1, %v667_v4, 0.0 }
 0x40b   :  { %v602_v53 = vadd.f32 %v586_v59, %v2539_v39  ;;  %v2072_v41 = vadd.f32 %v600_v21, %v2540_v22  ;;  %v640_v44 = vsel %vm176_vm1, %v2054_v15, 0.0  ;;  %v670_v14 = vmul.f32 %v2036_v51, %v2036_v51 }
 0x40c   :  { %v639_v35 = vadd.f32 %v638_v36, %v637_v29  ;;  %v689_v56 = vadd.f32 %v688_v19, %v687_v38  ;;  %v690_v52 = vsel %vm176_vm1, %v668_v6, 0.0  ;;  %v2080_v37 = vadd.f32 %v601_v62, %v2541_v31 }
 0x40d   :  { %v642_v30 = vsel %vm176_vm1, %v2063_v55, 0.0  ;;  %v671_v49 = vmul.f32 %v2045_v46, %v2045_v46  ;;  %v692_v27 = vsel %vm176_vm1, %v669_v2, 0.0  ;;  %v2088_v57 = vadd.f32 %v602_v53, %v2542_v25 }
 0x40e   :  { %v641_v42 = vadd.f32 %v640_v44, %v639_v35  ;;  %v691_v11 = vadd.f32 %v690_v52, %v689_v56  ;;  %v644_v17 = vsel %vm176_vm1, %v2072_v41, 0.0  ;;  %v672_v48 = vmul.f32 %v2054_v15, %v2054_v15 }
 0x40f   :  { %v694_v12 = vsel %vm176_vm1, %v670_v14, 0.0  ;;  %v646_v61 = vsel %vm176_vm1, %v2080_v37, 0.0  ;;  %v673_v54 = vmul.f32 %v2063_v55, %v2063_v55  ;;  %v696_v3 = vsel %vm176_vm1, %v671_v49, 0.0 }
 0x410   :  { %v643_v20 = vadd.f32 %v642_v30, %v641_v42  ;;  %v693_v16 = vadd.f32 %v692_v27, %v691_v11  ;;  %v648_v47 = vsel %vm176_vm1, %v2088_v57, 0.0  ;;  %v674_v24 = vmul.f32 %v2072_v41, %v2072_v41 }
 0x411   :  { %v698_v4 = vsel %vm176_vm1, %v672_v48, 0.0  ;;  %v675_v9 = vmul.f32 %v2080_v37, %v2080_v37  ;;  %v700_v21 = vsel %vm176_vm1, %v673_v54, 0.0  ;;  %v676_v45 = vmul.f32 %v2088_v57, %v2088_v57 }
 0x412   :  { %v645_v60 = vadd.f32 %v644_v17, %v643_v20  ;;  %v695_v13 = vadd.f32 %v694_v12, %v693_v16  ;;  %v702_v8 = vsel %vm176_vm1, %v674_v24, 0.0  ;;  %v1322_v30 = vmov 0  }
 0x413   :  { %v704_v6 = vsel %vm176_vm1, %v675_v9, 0.0  ;;  %v706_v32 = vsel %vm176_vm1, %v676_v45, 0.0  ;;  %1232 = vset.pattern.permute.xlu0 %v1322_v30  ;;  %1231 = vset.pattern.permute.xlu2 %v1322_v30 }
 0x414   :  { %v647_v1 = vadd.f32 %v646_v61, %v645_v60  ;;  %v697_v10 = vadd.f32 %v696_v3, %v695_v13  ;;  %1230 = vset.pattern.permute.xlu1 %v1322_v30 }
 0x416   :  { %v649_v59 = vadd.f32 %v648_v47, %v647_v1  ;;  %v699_v5 = vadd.f32 %v698_v4, %v697_v10 }
 0x418   :  { %650 = vadd.xlane.f32.xlu2 %v649_v59  ;;  %v701_v43 = vadd.f32 %v700_v21, %v699_v5 }
 0x41a   :  { %v703_v29 = vadd.f32 %v702_v8, %v701_v43 }
 0x41c   :  { %v705_v23 = vadd.f32 %v704_v6, %v703_v29 }
 0x41e   :  { %v707_v62 = vadd.f32 %v706_v32, %v705_v23 }
 0x420   :  { %708 = vadd.xlane.f32.xlu0 %v707_v62 }
 0x48b   :  { %v651_v40 = vpop.xlane.xlu2 %650 }
 0x48c   :  { %v652_v36 = vrot.slane %v651_v40, 4 }
 0x48e   :  { %v653_v38 = vadd.f32 %v652_v36, %v651_v40 }
 0x490   :  { %v654_v35 = vrot.slane %v653_v38, 2 }
 0x492   :  { %v655_v2 = vadd.f32 %v654_v35, %v653_v38 }
 0x493   :  { %v709_v19 = vpop.xlane.xlu0 %708 }
 0x494   :  { %v656_v39 = vrot.slane %v655_v2, 1  ;;  %v710_v53 = vrot.slane %v709_v19, 4 }
 0x496   :  { %v657_v22 = vadd.f32 %v656_v39, %v655_v2  ;;  %v711_v44 = vadd.f32 %v710_v53, %v709_v19 }
 0x498   :  { %1224 = vpush %v657_v22  ;;  %v712_v56 = vrot.slane %v711_v44, 2 }
 0x49a   :  { %v713_v42 = vadd.f32 %v712_v56, %v711_v44 }
 0x49c   :  { %v714_v14 = vrot.slane %v713_v42, 1 }
 0x49e   :  { %v715_v52 = vadd.f32 %v714_v14, %v713_v42 }
 0x4a0   :  { %1226 = vpush %v715_v52 }
 0x4c9   :  { %s1225_s28 = spop %1224 }
 0x4ca   :  { %v659_v31 = vstv %s1225_s28 }
 0x4cb   :  { %v2114_v11 = vmul.f32 %v659_v31, %v1631_v28 }
 0x4cd   :  { %v719_v20 = vmul.f32 %v2114_v11, %v2114_v11  ;;  %v723_v1 = vsub.f32 %v1966_v63, %v2114_v11  ;;  %v722_v54 = vsub.f32 %v1955_v18, %v2114_v11  ;;  %v730_v3 = vsub.f32 %v2036_v51, %v2114_v11 }
 0x4ce   :  { %v724_v10 = vsub.f32 %v1975_v26, %v2114_v11  ;;  %v725_v59 = vsub.f32 %v1988_v58, %v2114_v11  ;;  %v733_v63 = vsub.f32 %v2063_v55, %v2114_v11  ;;  %v726_v8 = vsub.f32 %v1997_v7, %v2114_v11 }
 0x4cf   :  { %v727_v32 = vsub.f32 %v2008_v33, %v2114_v11  ;;  %v736_v19 = vsub.f32 %v2088_v57, %v2114_v11  ;;  %v728_v7 = vsub.f32 %v2017_v50, %v2114_v11  ;;  %v729_v33 = vsub.f32 %v2027_v34, %v2114_v11 }
 0x4d0   :  { %v731_v22 = vsub.f32 %v2045_v46, %v2114_v11  ;;  %v732_v50 = vsub.f32 %v2054_v15, %v2114_v11 }
 0x4d1   :  { %s1227_s29 = spop %1226 }
 0x4d2   :  { %v717_v49 = vstv %s1227_s29 }
 0x4d3   :  { %v718_v27 = vmul.f32 %v717_v49, %v1631_v28  ;;  %v721_v28 = vsub.f32 %v1952_v0, %v2114_v11 }
 0x4d5   :  { %v720_v25 = vsub.f32 %v718_v27, %v719_v20 }
 0x4d7   :  { %v737_v17 = vadd.f32 1e-05, %v720_v25 }
 0x4d9   :  { %1239 = vrsqrt.f32 %v737_v17  ;;  %vm744_vm10 = vweird.f32 %v737_v17 }
 0x4df   :  { %v1240_v16 = vpop.eup %1239 }
 0x4e0   :  { %v739_v60 = vmul.f32 %v1240_v16, %v737_v17  ;;  %vm745_vm9 = vweird.f32 %v1240_v16 }
 0x4e1   :  { %vm746_vm11 = vmor %vm744_vm10, %vm745_vm9 }
 0x4e2   :  { %v740_v48 = vmul.f32 %v1240_v16, %v739_v60 }
 0x4e4   :  { %v741_v12 = vmul.f32 0.5, %v740_v48 }
 0x4e6   :  { %v742_v61 = vsub.f32 1.5, %v741_v12  ;;  %v734_v12 = vsub.f32 %v2072_v41, %v2114_v11 }
 0x4e8   :  { %v743_v13 = vmul.f32 %v1240_v16, %v742_v61  ;;  %v735_v61 = vsub.f32 %v2080_v37, %v2114_v11 }
 0x4ea   :  { %v2127_v47 = vsel %vm746_vm11, %v1240_v16, %v743_v13 }
 0x4eb   :  { %v750_v24 = vmul.f32 %v2127_v47, %v723_v1  ;;  %v749_v18 = vmul.f32 %v2127_v47, %v722_v54  ;;  %v748_v0 = vmul.f32 %v2127_v47, %v721_v28  ;;  %v757_v4 = vmul.f32 %v2127_v47, %v730_v3 }
 0x4ec   :  { %v751_v51 = vmul.f32 %v2127_v47, %v724_v10  ;;  %v752_v5 = vmul.f32 %v2127_v47, %v725_v59  ;;  %v760_v26 = vmul.f32 %v2127_v47, %v733_v63  ;;  %v753_v40 = vmul.f32 %v2127_v47, %v726_v8 }
 0x4ed   :  { %v766_v9 = vsub.f32 0.0, %v750_v24  ;;  %v765_v21 = vsub.f32 0.0, %v749_v18  ;;  %v764_v58 = vsub.f32 0.0, %v748_v0  ;;  %v773_v43 = vsub.f32 0.0, %v757_v4 }
 0x4ee   :  { %v767_v45 = vsub.f32 0.0, %v751_v51  ;;  %v768_v55 = vsub.f32 0.0, %v752_v5  ;;  %v776_v38 = vsub.f32 0.0, %v760_v26  ;;  %v754_v35 = vmul.f32 %v2127_v47, %v727_v32 }
 0x4ef   :  { %v784_v29 = vmul.f32 1.442695, %v766_v9  ;;  %v782_v6 = vmul.f32 1.442695, %v765_v21  ;;  %v780_v23 = vmul.f32 1.442695, %v764_v58  ;;  %v763_v53 = vmul.f32 %v2127_v47, %v736_v19 }
 0x4f0   :  { %v798_v62 = vmul.f32 1.442695, %v773_v43  ;;  %v786_v36 = vmul.f32 1.442695, %v767_v45  ;;  %v788_v2 = vmul.f32 1.442695, %v768_v55  ;;  %v755_v42 = vmul.f32 %v2127_v47, %v728_v7 }
 0x4f1   :  { %1241 = vpow2.f32 %v784_v29  ;;  %v769_v39 = vsub.f32 0.0, %v753_v40  ;;  %v804_v44 = vmul.f32 1.442695, %v776_v38  ;;  %v770_v56 = vsub.f32 0.0, %v754_v35 }
 0x4f2   :  { %1243 = vpow2.f32 %v782_v6  ;;  %v756_v57 = vmul.f32 %v2127_v47, %v729_v33  ;;  %v758_v34 = vmul.f32 %v2127_v47, %v731_v22  ;;  %v779_v20 = vsub.f32 0.0, %v763_v53 }
 0x4f3   :  { %1245 = vpow2.f32 %v780_v23  ;;  %v790_v30 = vmul.f32 1.442695, %v769_v39  ;;  %v759_v46 = vmul.f32 %v2127_v47, %v732_v50  ;;  %v792_v25 = vmul.f32 1.442695, %v770_v56 }
 0x4f4   :  { %1247 = vpow2.f32 %v798_v62  ;;  %v771_v17 = vsub.f32 0.0, %v755_v42  ;;  %v772_v15 = vsub.f32 0.0, %v756_v57  ;;  %v774_v48 = vsub.f32 0.0, %v758_v34 }
 0x4f5   :  { %1249 = vpow2.f32 %v786_v36  ;;  %v775_v28 = vsub.f32 0.0, %v759_v46  ;;  %v2179_v10 = vmul.f32 1.442695, %v779_v20  ;;  %v2199_v21 = vmul.f32 %v2127_v47, %v734_v12 }
 0x4f6   :  { %1251 = vpow2.f32 %v788_v2  ;;  %v2181_v59 = vmul.f32 1.442695, %v771_v17  ;;  %v2186_v24 = vmul.f32 1.442695, %v772_v15  ;;  %v2194_v26 = vmul.f32 1.442695, %v774_v48 }
 0x4f7   :  { %v1242_v14 = vpop.eup %1241  ;;  %1253 = vpow2.f32 %v804_v44  ;;  %v2196_v9 = vmul.f32 1.442695, %v775_v28 }
 0x4f8   :  { %v1244_v52 = vpop.eup %1243  ;;  %v2162_v31 = vadd.f32 1.0, %v1242_v14 }
 0x4f9   :  { %v1246_v49 = vpop.eup %1245  ;;  %v2165_v27 = vadd.f32 1.0, %v1244_v52 }
 0x4fa   :  { %v1248_v16 = vpop.eup %1247  ;;  %1255 = vrcp.f32 %v2162_v31  ;;  %v2173_v1 = vadd.f32 1.0, %v1246_v49  ;;  %v867_v63 = vand.u32 2147483647, %v2162_v31  ;;  %v869_v41 = vand.u32 2147483648, %v2162_v31 }
 0x4fb   :  { %v1250_v60 = vpop.eup %1249  ;;  %1257 = vrcp.f32 %v2165_v27  ;;  %v2175_v54 = vadd.f32 1.0, %v1248_v16  ;;  %v852_v0 = vand.u32 2147483647, %v2165_v27  ;;  %v854_v4 = vand.u32 2147483648, %v2165_v27 }
 0x4fc   :  { %v1252_v13 = vpop.eup %1251  ;;  %1259 = vpow2.f32 %v790_v30  ;;  %v2177_v3 = vadd.f32 1.0, %v1250_v60  ;;  %vm863_vm12 = vweird.f32 %v2162_v31  ;;  %v837_v45 = vand.u32 2147483647, %v2173_v1 }
 0x4fd   :  { %1261 = vpow2.f32 %v792_v25  ;;  %v1254_v18 = vpop.eup %1253  ;;  %v2191_v51 = vadd.f32 1.0, %v1252_v13  ;;  %v839_v55 = vand.u32 2147483648, %v2173_v1  ;;  %vm2205_vm13 = vcmp.eq.f32.partialorder %v867_v63, 8.507059e+37 }
 0x4fe   :  { %1263 = vrcp.f32 %v2173_v1  ;;  %v870_v6 = vor.u32 1.1754944e-38, %v869_v41  ;;  %vm848_vm14 = vweird.f32 %v2165_v27  ;;  %vm2211_vm15 = vcmp.eq.f32.partialorder %v852_v0, 8.507059e+37 }
 0x4ff   :  { %1265 = vrcp.f32 %v2175_v54  ;;  %v855_v36 = vor.u32 1.1754944e-38, %v854_v4  ;;  %vm833_vm1 = vweird.f32 %v2173_v1  ;;  %v972_v2 = vand.u32 2147483647, %v2175_v54 }
 0x500   :  { %v1256_v5 = vpop.eup %1255  ;;  %1267 = vrcp.f32 %v2177_v3  ;;  %v974_v19 = vand.u32 2147483648, %v2175_v54  ;;  %vm2222_vm3 = vcmp.eq.f32.partialorder %v837_v45, 8.507059e+37  ;;  %v840_v22 = vor.u32 1.1754944e-38, %v839_v55 }
 0x501   :  { %v1258_v58 = vpop.eup %1257  ;;  %v859_v43 = vmul.f32 %v1256_v5, %v2162_v31  ;;  %1269 = vrcp.f32 %v2191_v51  ;;  %vm864_vm2 = vweird.f32 %v1256_v5  ;;  %vm968_vm4 = vweird.f32 %v2175_v54 }
 0x502   :  { %v1260_v8 = vpop.eup %1259  ;;  %v844_v23 = vmul.f32 %v1258_v58, %v2165_v27  ;;  %vm849_vm5 = vweird.f32 %v1258_v58  ;;  %vm878_vm6 = vweird.f32 %v2177_v3  ;;  %v882_v34 = vand.u32 2147483647, %v2177_v3  ;;  %vm865_vm7 = vmor %vm863_vm12, %vm864_vm2 }
 0x503   :  { %v1262_v32 = vpop.eup %1261  ;;  %v860_v62 = vsub.f32 1.0, %v859_v43  ;;  %v2237_v20 = vadd.f32 1.0, %v1254_v18  ;;  %vm850_vm9 = vmor %vm848_vm14, %vm849_vm5  ;;  %v2243_v16 = vadd.f32 1.0, %v1260_v8  ;;  %v884_v0 = vand.u32 2147483648, %v2177_v3 }
 0x504   :  { %v1264_v38 = vpop.eup %1263  ;;  %v845_v35 = vsub.f32 1.0, %v844_v23  ;;  %v2262_v4 = vadd.f32 1.0, %v1262_v32  ;;  %v897_v43 = vand.u32 2147483647, %v2191_v51  ;;  %vm973_vm14 = vcmp.eq.f32.partialorder %v972_v2, 8.507059e+37 }
 0x505   :  { %v2219_v7 = vpop.eup %1265  ;;  %v861_v33 = vmul.f32 %v1256_v5, %v860_v62  ;;  %v829_v39 = vmul.f32 %v1264_v38, %v2173_v1  ;;  %vm834_vm8 = vweird.f32 %v1264_v38  ;;  %1271 = vrcp.f32 %v2237_v20 }
 0x506   :  { %v2227_v44 = vpop.eup %1267  ;;  %v846_v56 = vmul.f32 %v1258_v58, %v845_v35  ;;  %v964_v42 = vmul.f32 %v2219_v7, %v2175_v54  ;;  %vm969_vm10 = vweird.f32 %v2219_v7  ;;  %vm835_vm11 = vmor %vm833_vm1, %vm834_vm8  ;;  %1273 = vrcp.f32 %v2243_v16 }
 0x507   :  { %v862_v57 = vadd.f32 %v1256_v5, %v861_v33  ;;  %v830_v50 = vsub.f32 1.0, %v829_v39  ;;  %v874_v14 = vmul.f32 %v2227_v44, %v2177_v3  ;;  %v2239_v46 = vpop.eup %1269  ;;  %vm879_vm12 = vweird.f32 %v2227_v44 }
 0x508   :  { %v847_v52 = vadd.f32 %v1258_v58, %v846_v56  ;;  %v965_v30 = vsub.f32 1.0, %v964_v42  ;;  %v889_v48 = vmul.f32 %v2239_v46, %v2191_v51  ;;  %vm894_vm1 = vweird.f32 %v2239_v46 }
 0x509   :  { %v866_v49 = vsel %vm865_vm7, %v1256_v5, %v862_v57  ;;  %v831_v25 = vmul.f32 %v1264_v38, %v830_v50  ;;  %v875_v17 = vsub.f32 1.0, %v874_v14  ;;  %v899_v55 = vand.u32 2147483648, %v2191_v51 }
 0x50a   :  { %v871_v15 = vsel %vm2205_vm13, %v870_v6, %v866_v49  ;;  %v851_v31 = vsel %vm850_vm9, %v1258_v58, %v847_v52  ;;  %v966_v60 = vmul.f32 %v2219_v7, %v965_v30  ;;  %v890_v63 = vsub.f32 1.0, %v889_v48  ;;  %vm2268_vm13 = vmor %vm968_vm4, %vm969_vm10 }
 0x50b   :  { %1080 = vperm.xlu0 %1232, %v871_v15   ;;  %v856_v12 = vsel %vm2211_vm15, %v855_v36, %v851_v31  ;;  %v832_v13 = vadd.f32 %v1264_v38, %v831_v25  ;;  %v876_v27 = vmul.f32 %v2227_v44, %v875_v17  ;;  %vm2282_vm15 = vmor %vm878_vm6, %vm879_vm12  ;;  %v975_v8 = vor.u32 1.1754944e-38, %v974_v19  ;;  %v1272_v62 = vpop.eup %1271 }
 0x50c   :  { %1075 = vperm.xlu2 %1231, %v856_v12   ;;  %v967_v28 = vadd.f32 %v2219_v7, %v966_v60  ;;  %v891_v58 = vmul.f32 %v2239_v46, %v890_v63  ;;  %v1017_v23 = vand.u32 2147483647, %v2237_v20  ;;  %v885_v32 = vor.u32 1.1754944e-38, %v884_v0 }
 0x50d   :  { %v836_v41 = vsel %vm835_vm11, %v1264_v38, %v832_v13  ;;  %v877_v18 = vadd.f32 %v2227_v44, %v876_v27  ;;  %vm893_vm2 = vweird.f32 %v2191_v51  ;;  %v1019_v3 = vand.u32 2147483648, %v2237_v20 }
 0x50e   :  { %v841_v5 = vsel %vm2222_vm3, %v840_v22, %v836_v41  ;;  %v971_v45 = vsel %vm2268_vm13, %v2219_v7, %v967_v28  ;;  %v892_v6 = vadd.f32 %v2239_v46, %v891_v58  ;;  %1275 = vrcp.f32 %v2262_v4  ;;  %vm2296_vm4 = vmor %vm893_vm2, %vm894_vm1  ;;  %v1274_v7 = vpop.eup %1273 }
 0x50f   :  { %1070 = vperm.xlu1 %1230, %v841_v5   ;;  %v881_v29 = vsel %vm2282_vm15, %v2227_v44, %v877_v18  ;;  %v976_v40 = vsel %vm973_vm14, %v975_v8, %v971_v45  ;;  %vm883_vm3 = vcmp.eq.f32.partialorder %v882_v34, 8.507059e+37  ;;  %vm2300_vm5 = vcmp.eq.f32.partialorder %v897_v43, 8.507059e+37 }
 0x510   :  { %1277 = vpow2.f32 %v2179_v10  ;;  %v886_v35 = vsel %vm883_vm3, %v885_v32, %v881_v29  ;;  %v896_v51 = vsel %vm2296_vm4, %v2239_v46, %v892_v6  ;;  %v900_v2 = vor.u32 1.1754944e-38, %v899_v55 }
 0x511   :  { %v1009_v19 = vmul.f32 %v1272_v62, %v2237_v20  ;;  %vm1013_vm6 = vweird.f32 %v2237_v20  ;;  %vm2310_vm7 = vcmp.eq.f32.partialorder %v1017_v23, 8.507059e+37  ;;  %1279 = vpow2.f32 %v2181_v59 }
 0x512   :  { %v777_v10 = vsub.f32 0.0, %v2199_v21  ;;  %v1020_v53 = vor.u32 1.1754944e-38, %v1019_v3  ;;  %v904_v22 = vmul.f32 %v1274_v7, %v2243_v16  ;;  %1281 = vpow2.f32 %v2186_v24 }
 0x513   :  { %1115 = vperm.xlu0 %1232, %v976_v40   ;;  %v1010_v39 = vsub.f32 1.0, %v1009_v19  ;;  %v901_v44 = vsel %vm2300_vm5, %v900_v2, %v896_v51  ;;  %vm908_vm8 = vweird.f32 %v2243_v16  ;;  %1283 = vpow2.f32 %v2194_v26 }
 0x514   :  { %1085 = vperm.xlu2 %1231, %v886_v35   ;;  %v806_v56 = vmul.f32 1.442695, %v777_v10  ;;  %v1276_v42 = vpop.eup %1275  ;;  %vm1014_vm9 = vweird.f32 %v1272_v62  ;;  %v905_v59 = vsub.f32 1.0, %v904_v22  ;;  %v914_v21 = vand.u32 2147483648, %v2243_v16 }
 0x515   :  { %v1011_v57 = vmul.f32 %v1272_v62, %v1010_v39  ;;  %vm909_vm10 = vweird.f32 %v1274_v7  ;;  %v912_v14 = vand.u32 2147483647, %v2243_v16  ;;  %v919_v24 = vmul.f32 %v1276_v42, %v2262_v4  ;;  %vm1015_vm11 = vmor %vm1013_vm6, %vm1014_vm9 }
 0x516   :  { %v1278_v50 = vpop.eup %1277  ;;  %v762_v34 = vmul.f32 %v2127_v47, %v735_v61  ;;  %v906_v52 = vmul.f32 %v1274_v7, %v905_v59  ;;  %1285 = vpow2.f32 %v2196_v9  ;;  %v927_v25 = vand.u32 2147483647, %v2262_v4  ;;  %vm910_vm12 = vmor %vm908_vm8, %vm909_vm10 }
 0x517   :  { %1090 = vperm.xlu1 %1230, %v901_v44   ;;  %v1012_v26 = vadd.f32 %v1272_v62, %v1011_v57  ;;  %v2329_v30 = vadd.f32 1.0, %v1278_v50  ;;  %v1280_v46 = vpop.eup %1279  ;;  %v920_v49 = vsub.f32 1.0, %v919_v24  ;;  %v929_v17 = vand.u32 2147483648, %v2262_v4 }
 0x518   :  { %1287 = vpow2.f32 %v806_v56  ;;  %v1282_v15 = vpop.eup %1281  ;;  %v907_v11 = vadd.f32 %v1274_v7, %v906_v52  ;;  %v915_v47 = vor.u32 1.1754944e-38, %v914_v21  ;;  %vm924_vm13 = vweird.f32 %v1276_v42 }
 0x519   :  { %v1016_v37 = vsel %vm1015_vm11, %v1272_v62, %v1012_v26  ;;  %1289 = vrcp.f32 %v2329_v30  ;;  %v1284_v61 = vpop.eup %1283  ;;  %v921_v20 = vmul.f32 %v1276_v42, %v920_v49  ;;  %v778_v31 = vsub.f32 0.0, %v762_v34 }
 0x51a   :  { %v1021_v9 = vsel %vm2310_vm7, %v1020_v53, %v1016_v37  ;;  %v911_v60 = vsel %vm910_vm12, %v1274_v7, %v907_v11  ;;  %vm913_vm14 = vcmp.eq.f32.partialorder %v912_v14, 8.507059e+37  ;;  %v2342_v48 = vadd.f32 1.0, %v1280_v46 }
 0x51b   :  { %1130 = vperm.xlu0 %1232, %v1021_v9   ;;  %v2344_v12 = vadd.f32 1.0, %v1282_v15  ;;  %v916_v13 = vsel %vm913_vm14, %v915_v47, %v911_v60  ;;  %v922_v27 = vadd.f32 %v1276_v42, %v921_v20  ;;  %vm923_vm15 = vweird.f32 %v2262_v4 }
 0x51c   :  { %v2347_v28 = vadd.f32 1.0, %v1284_v61  ;;  %v1286_v63 = vpop.eup %1285  ;;  %1095 = vperm.xlu2 %1231, %v916_v13   ;;  %vm925_vm1 = vmor %vm923_vm15, %vm924_vm13  ;;  %v930_v16 = vor.u32 1.1754944e-38, %v929_v17  ;;  %1291 = vrcp.f32 %v2342_v48  ;;  %vm928_vm2 = vcmp.eq.f32.partialorder %v927_v25, 8.507059e+37 }
 0x51d   :  { %v926_v18 = vsel %vm925_vm1, %v1276_v42, %v922_v27  ;;  %1293 = vrcp.f32 %v2344_v12  ;;  %v808_v0 = vmul.f32 1.442695, %v778_v31  ;;  %v1062_v4 = vand.u32 2147483647, %v2329_v30 }
 0x51e   :  { %v1288_v41 = vpop.eup %1287  ;;  %v931_v1 = vsel %vm928_vm2, %v930_v16, %v926_v18  ;;  %1295 = vrcp.f32 %v2347_v28  ;;  %v1064_v43 = vand.u32 2147483648, %v2329_v30  ;;  %v2355_v54 = vadd.f32 1.0, %v1286_v63 }
 0x51f   :  { %v1290_v5 = vpop.eup %1289  ;;  %1100 = vperm.xlu1 %1230, %v931_v1   ;;  %v2357_v55 = vadd.f32 1.0, %v1288_v41  ;;  %1297 = vpow2.f32 %v808_v0  ;;  %vm1058_vm4 = vweird.f32 %v2329_v30  ;;  %vm2362_vm5 = vcmp.eq.f32.partialorder %v1062_v4, 8.507059e+37 }
 0x520   :  { %v1054_v58 = vmul.f32 %v1290_v5, %v2329_v30  ;;  %vm1059_vm3 = vweird.f32 %v1290_v5  ;;  %1299 = vrcp.f32 %v2355_v54  ;;  %v1065_v3 = vor.u32 1.1754944e-38, %v1064_v43 }
 0x521   :  { %v942_v35 = vand.u32 2147483647, %v2342_v48  ;;  %1301 = vrcp.f32 %v2357_v55  ;;  %vm1060_vm6 = vmor %vm1058_vm4, %vm1059_vm3  ;;  %v944_v51 = vand.u32 2147483648, %v2342_v48  ;;  %v957_v19 = vand.u32 2147483647, %v2344_v12 }
 0x522   :  { %v1055_v45 = vsub.f32 1.0, %v1054_v58  ;;  %v1292_v8 = vpop.eup %1291  ;;  %v959_v53 = vand.u32 2147483648, %v2344_v12  ;;  %vm938_vm9 = vweird.f32 %v2342_v48  ;;  %vm953_vm10 = vweird.f32 %v2344_v12 }
 0x523   :  { %v1294_v29 = vpop.eup %1293  ;;  %v934_v23 = vmul.f32 %v1292_v8, %v2342_v48  ;;  %vm939_vm7 = vweird.f32 %v1292_v8  ;;  %v945_v21 = vor.u32 1.1754944e-38, %v944_v51  ;;  %vm943_vm12 = vcmp.eq.f32.partialorder %v942_v35, 8.507059e+37  ;;  %v1307_v51 = vld [vmem:[%s2515_s0 + $0x28] sm:$0xff] }
 0x524   :  { %v1056_v6 = vmul.f32 %v1290_v5, %v1055_v45  ;;  %v949_v62 = vmul.f32 %v1294_v29, %v2344_v12  ;;  %v2367_v40 = vpop.eup %1295  ;;  %vm954_vm8 = vweird.f32 %v1294_v29  ;;  %vm940_vm11 = vmor %vm938_vm9, %vm939_vm7  ;;  %v960_v52 = vor.u32 1.1754944e-38, %v959_v53 }
 0x525   :  { %v935_v38 = vsub.f32 1.0, %v934_v23  ;;  %v979_v7 = vmul.f32 %v2367_v40, %v2347_v28  ;;  %v1298_v33 = vpop.eup %1297  ;;  %vm955_vm13 = vmor %vm953_vm10, %vm954_vm8  ;;  %vm958_vm14 = vcmp.eq.f32.partialorder %v957_v19, 8.507059e+37  ;;  %vm984_vm15 = vweird.f32 %v2367_v40 }
 0x526   :  { %v1057_v36 = vadd.f32 %v1290_v5, %v1056_v6  ;;  %v950_v2 = vsub.f32 1.0, %v949_v62  ;;  %v1300_v42 = vpop.eup %1299  ;;  %v2380_v59 = vadd.f32 1.0, %v1298_v33  ;;  %v989_v37 = vand.u32 2147483648, %v2347_v28 }
 0x527   :  { %v936_v39 = vmul.f32 %v1292_v8, %v935_v38  ;;  %v980_v56 = vsub.f32 1.0, %v979_v7  ;;  %v994_v24 = vmul.f32 %v1300_v42, %v2355_v54  ;;  %v1302_v34 = vpop.eup %1301  ;;  %vm999_vm1 = vweird.f32 %v1300_v42  ;;  %v1308_v7 = vld [vmem:[%s2515_s0 + $0x10] sm:$0xff] }
 0x528   :  { %v1061_v10 = vsel %vm1060_vm6, %v1290_v5, %v1057_v36  ;;  %v951_v44 = vmul.f32 %v1294_v29, %v950_v2  ;;  %1303 = vrcp.f32 %v2380_v59  ;;  %v1024_v15 = vmul.f32 %v1302_v34, %v2357_v55  ;;  %v1306_v36 = vld [vmem:[%s2515_s0 + $0x18] sm:$0xff] }
 0x529   :  { %v1066_v22 = vsel %vm2362_vm5, %v1065_v3, %v1061_v10  ;;  %v937_v57 = vadd.f32 %v1292_v8, %v936_v39  ;;  %v981_v14 = vmul.f32 %v2367_v40, %v980_v56  ;;  %v995_v49 = vsub.f32 1.0, %v994_v24  ;;  %v1305_v3 = vld [vmem:[%s2515_s0 + $0x8] sm:$0xff]  ;;  %v1309_v39 = vld [vmem:[%s2515_s0] sm:$0xff] }
 0x52a   :  { %1145 = vperm.xlu0 %1232, %v1066_v22   ;;  %v952_v50 = vadd.f32 %v1294_v29, %v951_v44  ;;  %vm983_vm2 = vweird.f32 %v2347_v28  ;;  %v987_v47 = vand.u32 2147483647, %v2347_v28  ;;  %v1004_v61 = vand.u32 2147483648, %v2355_v54  ;;  %v1310_v44 = vld [vmem:[%s2515_s0 + $0x48] sm:$0xff] }
 0x52b   :  { %v941_v26 = vsel %vm940_vm11, %v1292_v8, %v937_v57  ;;  %v982_v17 = vadd.f32 %v2367_v40, %v981_v14  ;;  %v996_v11 = vmul.f32 %v1300_v42, %v995_v49  ;;  %v1025_v9 = vsub.f32 1.0, %v1024_v15  ;;  %vm985_vm3 = vmor %vm983_vm2, %vm984_vm15 }
 0x52c   :  { %v946_v30 = vsel %vm943_vm12, %v945_v21, %v941_v26  ;;  %v956_v46 = vsel %vm955_vm13, %v1294_v29, %v952_v50  ;;  %vm998_vm4 = vweird.f32 %v2355_v54  ;;  %v1002_v31 = vand.u32 2147483647, %v2355_v54  ;;  %v1312_v50 = vld [vmem:[%s2515_s0 + $0x38] sm:$0xff] }
 0x52d   :  { %1105 = vperm.xlu2 %1231, %v946_v30   ;;  %v961_v25 = vsel %vm958_vm14, %v960_v52, %v956_v46  ;;  %v997_v20 = vadd.f32 %v1300_v42, %v996_v11  ;;  %v986_v48 = vsel %vm985_vm3, %v2367_v40, %v982_v17  ;;  %vm1000_vm5 = vmor %vm998_vm4, %vm999_vm1  ;;  %v1026_v12 = vmul.f32 %v1302_v34, %v1025_v9  ;;  %v1314_v30 = vld [vmem:[%s2515_s0 + $0x50] sm:$0xff] }
 0x52e   :  { %1110 = vperm.xlu1 %1230, %v961_v25   ;;  %v1304_v60 = vpop.eup %1303  ;;  %v990_v13 = vor.u32 1.1754944e-38, %v989_v37  ;;  %vm988_vm6 = vcmp.eq.f32.partialorder %v987_v47, 8.507059e+37  ;;  %v1005_v28 = vor.u32 1.1754944e-38, %v1004_v61  ;;  %vm1003_vm7 = vcmp.eq.f32.partialorder %v1002_v31, 8.507059e+37  ;;  %v1315_v25 = vld [vmem:[%s2515_s0 + $0x30] sm:$0xff]  ;;  %v1316_v37 = vld [vmem:[%s2515_s0 + $0x68] sm:$0xff] }
 0x52f   :  { %v1001_v27 = vsel %vm1000_vm5, %v1300_v42, %v997_v20  ;;  %v1039_v63 = vmul.f32 %v1304_v60, %v2380_v59  ;;  %v1027_v0 = vadd.f32 %v1302_v34, %v1026_v12  ;;  %vm1029_vm8 = vweird.f32 %v1302_v34  ;;  %v1317_v61 = vld [vmem:[%s2515_s0 + $0x78] sm:$0xff]  ;;  %v1318_v31 = vld [vmem:[%s2515_s0 + $0x40] sm:$0xff] }
 0x530   :  { %v991_v16 = vsel %vm988_vm6, %v990_v13, %v986_v48  ;;  %v1006_v18 = vsel %vm1003_vm7, %v1005_v28, %v1001_v27  ;;  %v1034_v5 = vand.u32 2147483648, %v2357_v55  ;;  %vm1044_vm9 = vweird.f32 %v1304_v60  ;;  %v1319_v12 = vld [vmem:[%s2515_s0 + $0x58] sm:$0xff] }
 0x531   :  { %v1040_v41 = vsub.f32 1.0, %v1039_v63  ;;  %vm1028_vm10 = vweird.f32 %v2357_v55  ;;  %v1032_v58 = vand.u32 2147483647, %v2357_v55  ;;  %v1049_v4 = vand.u32 2147483648, %v2380_v59  ;;  %v1320_v63 = vld [vmem:[%s2515_s0 + $0x70] sm:$0xff] }
 0x532   :  { %vm1030_vm11 = vmor %vm1028_vm10, %vm1029_vm8  ;;  %vm1043_vm12 = vweird.f32 %v2380_v59  ;;  %v1047_v45 = vand.u32 2147483647, %v2380_v59  ;;  %v1035_v8 = vor.u32 1.1754944e-38, %v1034_v5  ;;  %v1311_v59 = vld [vmem:[%s2515_s0 + $0x20] sm:$0xff] }
 0x533   :  { %v1041_v1 = vmul.f32 %v1304_v60, %v1040_v41  ;;  %v1031_v54 = vsel %vm1030_vm11, %v1302_v34, %v1027_v0  ;;  %vm1045_vm13 = vmor %vm1043_vm12, %vm1044_vm9  ;;  %vm1033_vm14 = vcmp.eq.f32.partialorder %v1032_v58, 8.507059e+37  ;;  %v1050_v6 = vor.u32 1.1754944e-38, %v1049_v4  ;;  %v1313_v34 = vld [vmem:[%s2515_s0 + $0x60] sm:$0xff] }
 0x534   :  { %v1036_v23 = vsel %vm1033_vm14, %v1035_v8, %v1031_v54  ;;  %vm1048_vm15 = vcmp.eq.f32.partialorder %v1047_v45, 8.507059e+37 }
 0x535   :  { %1120 = vperm.xlu2 %1231, %v991_v16   ;;  %v1042_v43 = vadd.f32 %v1304_v60, %v1041_v1 }
 0x536   :  { %1125 = vperm.xlu1 %1230, %v1006_v18  }
 0x537   :  { %v1046_v29 = vsel %vm1045_vm13, %v1304_v60, %v1042_v43 }
 0x538   :  { %v1051_v32 = vsel %vm1048_vm15, %v1050_v6, %v1046_v29 }
 0x53d   :  { %1135 = vperm.xlu2 %1231, %v1036_v23  }
 0x53e   :  { %1140 = vperm.xlu1 %1230, %v1051_v32  }
 0x566   :  { %v1076_v55 = vpop.permute.xlu2 %1075 }
 0x567   :  { %v1149_v62 = vmul.f32 %v1305_v3, %v1076_v55 }
 0x569   :  { %1165 = vst.msk [vmem:[%s2518_s3 + $0x8] sm:$0xff] %vm30_vm0, %v1149_v62 }
 0x56e   :  { %v1086_v40 = vpop.permute.xlu2 %1085 }
 0x56f   :  { %v1151_v38 = vmul.f32 %v1306_v36, %v1086_v40 }
 0x571   :  { %1167 = vst.msk [vmem:[%s2518_s3 + $0x18] sm:$0xff] %vm30_vm0, %v1151_v38 }
 0x576   :  { %v1096_v35 = vpop.permute.xlu2 %1095 }
 0x577   :  { %v1153_v2 = vmul.f32 %v1307_v51, %v1096_v35 }
 0x579   :  { %1169 = vst.msk [vmem:[%s2518_s3 + $0x28] sm:$0xff] %vm30_vm0, %v1153_v2 }
 0x57d   :  { %v1081_v19 = vpop.permute.xlu0 %1080 }
 0x57e   :  { %v1150_v33 = vmul.f32 %v1308_v7, %v1081_v19 }
 0x580   :  { %1166 = vst.msk [vmem:[%s2518_s3 + $0x10] sm:$0xff] %vm30_vm0, %v1150_v33 }
 0x581   :  { %v1071_v10 = vpop.permute.xlu1 %1070 }
 0x582   :  { %v1148_v53 = vmul.f32 %v1309_v39, %v1071_v10 }
 0x584   :  { %1164 = vst.msk [vmem:[%s2518_s3] sm:$0xff] %vm30_vm0, %v1148_v53 }
 0x585   :  { %v1116_v22 = vpop.permute.xlu0 %1115 }
 0x586   :  { %v1157_v56 = vmul.f32 %v1310_v44, %v1116_v22 }
 0x587   :  { %v1106_v57 = vpop.permute.xlu2 %1105 }
 0x588   :  { %1173 = vst.msk [vmem:[%s2518_s3 + $0x48] sm:$0xff] %vm30_vm0, %v1157_v56  ;;  %v1155_v14 = vmul.f32 %v1312_v50, %v1106_v57 }
 0x589   :  { %v1091_v42 = vpop.permute.xlu1 %1090 }
 0x58a   :  { %v1152_v21 = vmul.f32 %v1311_v59, %v1091_v42  ;;  %1171 = vst.msk [vmem:[%s2518_s3 + $0x38] sm:$0xff] %vm30_vm0, %v1155_v14 }
 0x58c   :  { %1168 = vst.msk [vmem:[%s2518_s3 + $0x20] sm:$0xff] %vm30_vm0, %v1152_v21 }
 0x58d   :  { %v1131_v24 = vpop.permute.xlu0 %1130 }
 0x58e   :  { %v1160_v26 = vmul.f32 %v1313_v34, %v1131_v24 }
 0x58f   :  { %v1121_v52 = vpop.permute.xlu2 %1120 }
 0x590   :  { %1176 = vst.msk [vmem:[%s2518_s3 + $0x60] sm:$0xff] %vm30_vm0, %v1160_v26  ;;  %v1158_v46 = vmul.f32 %v1314_v30, %v1121_v52 }
 0x591   :  { %v1101_v49 = vpop.permute.xlu1 %1100 }
 0x592   :  { %1174 = vst.msk [vmem:[%s2518_s3 + $0x50] sm:$0xff] %vm30_vm0, %v1158_v46  ;;  %v1154_v17 = vmul.f32 %v1315_v25, %v1101_v49 }
 0x594   :  { %1170 = vst.msk [vmem:[%s2518_s3 + $0x30] sm:$0xff] %vm30_vm0, %v1154_v17 }
 0x597   :  { %v1136_v15 = vpop.permute.xlu2 %1135 }
 0x598   :  { %v1161_v11 = vmul.f32 %v1316_v37, %v1136_v15 }
 0x59a   :  { %1177 = vst.msk [vmem:[%s2518_s3 + $0x68] sm:$0xff] %vm30_vm0, %v1161_v11 }
 0x59c   :  { %v1146_v47 = vpop.permute.xlu0 %1145 }
 0x59d   :  { %v1163_v9 = vmul.f32 %v1317_v61, %v1146_v47 }
 0x59f   :  { %1179 = vst.msk [vmem:[%s2518_s3 + $0x78] sm:$0xff] %vm30_vm0, %v1163_v9 }
 0x5a0   :  { %v1111_v20 = vpop.permute.xlu1 %1110 }
 0x5a1   :  { %v1156_v60 = vmul.f32 %v1318_v31, %v1111_v20 }
 0x5a3   :  { %1172 = vst.msk [vmem:[%s2518_s3 + $0x40] sm:$0xff] %vm30_vm0, %v1156_v60 }
 0x5a8   :  { %v1126_v48 = vpop.permute.xlu1 %1125 }
 0x5a9   :  { %v1159_v13 = vmul.f32 %v1319_v12, %v1126_v48 }
 0x5ab   :  { %1175 = vst.msk [vmem:[%s2518_s3 + $0x58] sm:$0xff] %vm30_vm0, %v1159_v13 }
 0x5b0   :  { %v1141_v27 = vpop.permute.xlu1 %1140 }
 0x5b1   :  { %v1162_v28 = vmul.f32 %v1320_v63, %v1141_v27 }
 0x5b3   :  { %1178 = vst.msk [vmem:[%s2518_s3 + $0x70] sm:$0xff] %vm30_vm0, %v1162_v28 }

</bundles_post_ra>
